<compile_context>
chip_gen: v7x
topology: tpu7x:2x2x1
jax: 0.10.0
libtpu: 0.0.40
codegen_flags: <defaults>
</compile_context>

<pallas_src>
import functools

import jax
import jax.numpy as jnp
from jax.experimental import pallas as pl
from jax.experimental.pallas import tpu as pltpu


def _round_up(x, m):
    return (x + m - 1) // m * m


# ---------------------------------------------------------------------------
# Constants (plain JAX, computed once per scale)
# ---------------------------------------------------------------------------
def _hann_periodic(n):
    return 0.5 - 0.5 * jnp.cos(
        2.0 * jnp.pi * jnp.arange(n, dtype=jnp.float32) / n)


def _mel_filterbank(n_freqs, n_mels, sample_rate):
    """HTK mel filterbank, norm=None (torchaudio melscale_fbanks defaults)."""
    f_min = 0.0
    f_max = float(sample_rate // 2)

    def hz2mel(f):
        return 2595.0 * jnp.log10(1.0 + f / 700.0)

    def mel2hz(m):
        return 700.0 * (10.0 ** (m / 2595.0) - 1.0)

    all_freqs = jnp.linspace(0.0, float(sample_rate // 2), n_freqs)
    m_pts = jnp.linspace(hz2mel(f_min), hz2mel(f_max), n_mels + 2)
    f_pts = mel2hz(m_pts)
    f_diff = f_pts[1:] - f_pts[:-1]                       # (n_mels + 1,)
    slopes = f_pts[None, :] - all_freqs[:, None]          # (n_freqs, n_mels+2)
    down = (-slopes[:, :-2]) / f_diff[:-1]
    up = slopes[:, 2:] / f_diff[1:]
    return jnp.maximum(0.0, jnp.minimum(down, up)).astype(jnp.float32)


def _stft_constants(n_fft, n_mels, sample_rate):
    """Window-folded real/imag DFT matrices + mel filterbank, lane-padded."""
    n_freq = n_fft // 2 + 1
    win = _hann_periodic(n_fft)
    n = jnp.arange(n_fft)[:, None]
    k = jnp.arange(n_freq)[None, :]
    # exact angle reduction: (n*k) mod n_fft keeps f32 trig accurate
    ang = 2.0 * jnp.pi * ((n * k) % n_fft).astype(jnp.float32) / n_fft
    wc = win[:, None] * jnp.cos(ang)        # (n_fft, n_freq)
    ws = -win[:, None] * jnp.sin(ang)       # (n_fft, n_freq)
    fb = _mel_filterbank(n_freq, n_mels, sample_rate)     # (n_freq, n_mels)

    f_pad = _round_up(n_freq, 128)
    m_pad = _round_up(n_mels, 128)
    wc = jnp.pad(wc, ((0, 0), (0, f_pad - n_freq)))
    ws = jnp.pad(ws, ((0, 0), (0, f_pad - n_freq)))
    fb = jnp.pad(fb, ((0, f_pad - n_freq), (0, m_pad - n_mels)))
    return (wc.astype(jnp.bfloat16),
            ws.astype(jnp.bfloat16),
            fb.astype(jnp.bfloat16))


def _frame_signal(x_bc_t, n_fft, hop):
    """Reflect center-pad + overlapped framing (torch.stft center=True)."""
    bc, t = x_bc_t.shape
    pad = n_fft // 2
    xp = jnp.pad(x_bc_t, ((0, 0), (pad, pad)), mode="reflect")
    n_frames = 1 + t // hop
    idx = jnp.arange(n_frames)[:, None] * hop + jnp.arange(n_fft)[None, :]
    return xp[:, idx], n_frames             # (bc, n_frames, n_fft)


# ---------------------------------------------------------------------------
# Pallas kernel: fused windowed-DFT magnitude + mel projection
# ---------------------------------------------------------------------------
def _mel_stft_kernel(frames_ref, wc_ref, ws_ref, fb_ref, o_ref):
    fr = frames_ref[...]                                        # (TM, n_fft) bf16
    re = jnp.dot(fr, wc_ref[...], preferred_element_type=jnp.float32)
    im = jnp.dot(fr, ws_ref[...], preferred_element_type=jnp.float32)
    mag = jnp.sqrt(re * re + im * im)                           # f32
    o_ref[...] = jnp.dot(mag.astype(fb_ref.dtype), fb_ref[...],
                         preferred_element_type=jnp.float32)


def _mel_stft_pallas(frames, wc, ws, fb, *, tile_m=128):
    """frames: (M, n_fft) bf16 -> (M, n_mels_padded) f32 mel magnitudes."""
    m, n_fft = frames.shape
    f_pad = wc.shape[1]
    m_mel = fb.shape[1]
    mp = _round_up(max(m, tile_m), tile_m)
    frames = jnp.pad(frames, ((0, mp - m), (0, 0)))

    out = pl.pallas_call(
        _mel_stft_kernel,
        out_shape=jax.ShapeDtypeStruct((mp, m_mel), jnp.float32),
        grid=(mp // tile_m,),
        in_specs=[
            pl.BlockSpec((tile_m, n_fft), lambda i: (i, 0)),
            pl.BlockSpec((n_fft, f_pad), lambda i: (0, 0)),   # resident weights
            pl.BlockSpec((n_fft, f_pad), lambda i: (0, 0)),
            pl.BlockSpec((f_pad, m_mel), lambda i: (0, 0)),
        ],
        out_specs=pl.BlockSpec((tile_m, m_mel), lambda i: (i, 0)),
        compiler_params=pltpu.CompilerParams(
            dimension_semantics=("parallel",)),
    )(frames, wc, ws, fb)
    return out[:m]


# ---------------------------------------------------------------------------
# MultiScaleSTFT forward (matches the PyTorch module semantics)
# ---------------------------------------------------------------------------
def multiscale_stft_forward(x, *, scales, sample_rate, num_mels,
                            normalized=False):
    """x: (b, c, t) -> list of (b*c, num_mels, n_frames) mel magnitudes."""
    # TODO(synk): normalized=True spectrogram normalization is not implemented
    # (the module's default, used here, is normalized=False).
    assert not normalized
    b, c, t = x.shape
    xs = x.reshape(b * c, t).astype(jnp.float32)

    outs = []
    for scale in scales:
        hop = scale // 4
        wc, ws, fb = _stft_constants(scale, num_mels, sample_rate)
        frames, n_frames = _frame_signal(xs, scale, hop)
        frames2 = frames.reshape(b * c * n_frames, scale).astype(jnp.bfloat16)
        mel = _mel_stft_pallas(frames2, wc, ws, fb)
        mel = mel[:, :num_mels].reshape(b * c, n_frames, num_mels)
        outs.append(jnp.transpose(mel, (0, 2, 1)))   # (b*c, n_mels, n_frames)
    return outs


# ---------------------------------------------------------------------------
# Pure-JAX reference (f32 rfft path) for correctness checking
# ---------------------------------------------------------------------------
def multiscale_stft_ref(x, *, scales, sample_rate, num_mels):
    b, c, t = x.shape
    xs = x.reshape(b * c, t).astype(jnp.float32)
    outs = []
    for scale in scales:
        hop = scale // 4
        win = _hann_periodic(scale)
        frames, _ = _frame_signal(xs, scale, hop)
        mag = jnp.abs(jnp.fft.rfft(frames * win, axis=-1))   # (bc, nf, n_freq)
        fb = _mel_filterbank(scale // 2 + 1, num_mels, sample_rate)
        mel = jnp.einsum("bnf,fm->bnm", mag, fb)
        outs.append(jnp.transpose(mel, (0, 2, 1)))
    return outs


if __name__ == "__main__":
    key = jax.random.PRNGKey(0)

    b, c, t = 2, 2, 512
    scales = (64, 128, 256)
    sample_rate = 16000
    num_mels = 16

    x = jax.random.normal(key, (b, c, t), jnp.float32)

    fwd = jax.jit(functools.partial(
        multiscale_stft_forward, scales=scales,
        sample_rate=sample_rate, num_mels=num_mels))
    outs = jax.block_until_ready(fwd(x))

    refs = jax.block_until_ready(multiscale_stft_ref(
        x, scales=scales, sample_rate=sample_rate, num_mels=num_mels))

    for scale, o, r in zip(scales, outs, refs):
        n_frames = 1 + t // (scale // 4)
        assert o.shape == (b * c, num_mels, n_frames), (scale, o.shape)
        # bf16 MXU inputs (f32 accumulate) vs f32 rfft reference
        assert jnp.allclose(o, r, rtol=3e-2, atol=3e-2), (
            scale, float(jnp.max(jnp.abs(o - r))))

    print("KERNEL_OK")
</pallas_src>

<mosaic_0001>
module attributes {stable_mosaic.version = 11 : i64} {
  func.func @_mel_stft_kernel(%arg0: i32, %arg1: memref<128x256xbf16, #tpu.memory_space<vmem>>, %arg2: memref<256x256xbf16, #tpu.memory_space<vmem>>, %arg3: memref<256x256xbf16, #tpu.memory_space<vmem>>, %arg4: memref<256x128xbf16, #tpu.memory_space<vmem>>, %arg5: memref<128x128xf32, #tpu.memory_space<vmem>>) attributes {dimension_semantics = [#tpu.dimension_semantics<parallel>], iteration_bounds = array<i64: 1>, scalar_prefetch = 0 : i64, scratch_operands = 0 : i64, tpu.core_type = #tpu.core_type<tc>, window_params = [{transform_indices = @transform_0, window_bounds = array<i64: 128, 256>}, {pipeline_mode = #tpu.pipeline_mode<synchronous>, transform_indices = @transform_1, window_bounds = array<i64: 256, 256>}, {pipeline_mode = #tpu.pipeline_mode<synchronous>, transform_indices = @transform_2, window_bounds = array<i64: 256, 256>}, {pipeline_mode = #tpu.pipeline_mode<synchronous>, transform_indices = @transform_3, window_bounds = array<i64: 256, 128>}, {transform_indices = @transform_4, window_bounds = array<i64: 128, 128>}]} {
    %c0 = arith.constant 0 : index
    %c0_0 = arith.constant 0 : index
    %0 = vector.load %arg1[%c0, %c0_0] : memref<128x256xbf16, #tpu.memory_space<vmem>>, vector<128x256xbf16>
    %c0_1 = arith.constant 0 : index
    %c0_2 = arith.constant 0 : index
    %1 = vector.load %arg2[%c0_1, %c0_2] : memref<256x256xbf16, #tpu.memory_space<vmem>>, vector<256x256xbf16>
    %cst = arith.constant dense<0.000000e+00> : vector<128x256xf32>
    %2 = tpu.matmul %0, %1, %cst {dimension_numbers = #tpu.dot_dimension_numbers<[1], [0], [0], [1], [0, 0, 1, 1], [], []>} : vector<128x256xbf16>, vector<256x256xbf16>, vector<128x256xf32> -> vector<128x256xf32>
    %c0_3 = arith.constant 0 : index
    %c0_4 = arith.constant 0 : index
    %3 = vector.load %arg3[%c0_3, %c0_4] : memref<256x256xbf16, #tpu.memory_space<vmem>>, vector<256x256xbf16>
    %cst_5 = arith.constant dense<0.000000e+00> : vector<128x256xf32>
    %4 = tpu.matmul %0, %3, %cst_5 {dimension_numbers = #tpu.dot_dimension_numbers<[1], [0], [0], [1], [0, 0, 1, 1], [], []>} : vector<128x256xbf16>, vector<256x256xbf16>, vector<128x256xf32> -> vector<128x256xf32>
    %5 = arith.mulf %2, %2 : vector<128x256xf32>
    %6 = arith.mulf %4, %4 : vector<128x256xf32>
    %7 = arith.addf %5, %6 : vector<128x256xf32>
    %8 = math.sqrt %7 : vector<128x256xf32>
    %9 = arith.truncf %8 : vector<128x256xf32> to vector<128x256xbf16>
    %c0_6 = arith.constant 0 : index
    %c0_7 = arith.constant 0 : index
    %10 = vector.load %arg4[%c0_6, %c0_7] : memref<256x128xbf16, #tpu.memory_space<vmem>>, vector<256x128xbf16>
    %cst_8 = arith.constant dense<0.000000e+00> : vector<128x128xf32>
    %11 = tpu.matmul %9, %10, %cst_8 {dimension_numbers = #tpu.dot_dimension_numbers<[1], [0], [0], [1], [0, 0, 1, 1], [], []>} : vector<128x256xbf16>, vector<256x128xbf16>, vector<128x128xf32> -> vector<128x128xf32>
    %c0_9 = arith.constant 0 : index
    %c0_10 = arith.constant 0 : index
    %12 = vector.load %arg5[%c0_9, %c0_10] : memref<128x128xf32, #tpu.memory_space<vmem>>, vector<128x128xf32>
    tpu.vector_store %arg5[%c0_9, %c0_10], %11 {strides = array<i32>} : memref<128x128xf32, #tpu.memory_space<vmem>>, vector<128x128xf32>,
    return
  }
  func.func @transform_0(%arg0: i32) -> (i32, i32) {
    %c0_i32 = arith.constant 0 : i32
    %c0_i32_0 = arith.constant 0 : i32
    return %arg0, %c0_i32 : i32, i32
  }
  func.func @transform_1(%arg0: i32) -> (i32, i32) {
    %c0_i32 = arith.constant 0 : i32
    %c0_i32_0 = arith.constant 0 : i32
    %c0_i32_1 = arith.constant 0 : i32
    return %c0_i32, %c0_i32_0 : i32, i32
  }
  func.func @transform_2(%arg0: i32) -> (i32, i32) {
    %c0_i32 = arith.constant 0 : i32
    %c0_i32_0 = arith.constant 0 : i32
    %c0_i32_1 = arith.constant 0 : i32
    return %c0_i32, %c0_i32_0 : i32, i32
  }
  func.func @transform_3(%arg0: i32) -> (i32, i32) {
    %c0_i32 = arith.constant 0 : i32
    %c0_i32_0 = arith.constant 0 : i32
    %c0_i32_1 = arith.constant 0 : i32
    return %c0_i32, %c0_i32_0 : i32, i32
  }
  func.func @transform_4(%arg0: i32) -> (i32, i32) {
    %c0_i32 = arith.constant 0 : i32
    %c0_i32_0 = arith.constant 0 : i32
    return %arg0, %c0_i32 : i32, i32
  }
}

module attributes {stable_mosaic.version = 11 : i64} {
  func.func @_mel_stft_kernel(%arg0: i32, %arg1: memref<128x64xbf16, #tpu.memory_space<vmem>>, %arg2: memref<64x128xbf16, #tpu.memory_space<vmem>>, %arg3: memref<64x128xbf16, #tpu.memory_space<vmem>>, %arg4: memref<128x128xbf16, #tpu.memory_space<vmem>>, %arg5: memref<128x128xf32, #tpu.memory_space<vmem>>) attributes {dimension_semantics = [#tpu.dimension_semantics<parallel>], iteration_bounds = array<i64: 2>, scalar_prefetch = 0 : i64, scratch_operands = 0 : i64, tpu.core_type = #tpu.core_type<tc>, window_params = [{transform_indices = @transform_0, window_bounds = array<i64: 128, 64>}, {pipeline_mode = #tpu.pipeline_mode<synchronous>, transform_indices = @transform_1, window_bounds = array<i64: 64, 128>}, {pipeline_mode = #tpu.pipeline_mode<synchronous>, transform_indices = @transform_2, window_bounds = array<i64: 64, 128>}, {pipeline_mode = #tpu.pipeline_mode<synchronous>, transform_indices = @transform_3, window_bounds = array<i64: 128, 128>}, {transform_indices = @transform_4, window_bounds = array<i64: 128, 128>}]} {
    %c0 = arith.constant 0 : index
    %c0_0 = arith.constant 0 : index
    %0 = vector.load %arg1[%c0, %c0_0] : memref<128x64xbf16, #tpu.memory_space<vmem>>, vector<128x64xbf16>
    %c0_1 = arith.constant 0 : index
    %c0_2 = arith.constant 0 : index
    %1 = vector.load %arg2[%c0_1, %c0_2] : memref<64x128xbf16, #tpu.memory_space<vmem>>, vector<64x128xbf16>
    %cst = arith.constant dense<0.000000e+00> : vector<128x128xf32>
    %2 = tpu.matmul %0, %1, %cst {dimension_numbers = #tpu.dot_dimension_numbers<[1], [0], [0], [1], [0, 0, 1, 1], [], []>} : vector<128x64xbf16>, vector<64x128xbf16>, vector<128x128xf32> -> vector<128x128xf32>
    %c0_3 = arith.constant 0 : index
    %c0_4 = arith.constant 0 : index
    %3 = vector.load %arg3[%c0_3, %c0_4] : memref<64x128xbf16, #tpu.memory_space<vmem>>, vector<64x128xbf16>
    %cst_5 = arith.constant dense<0.000000e+00> : vector<128x128xf32>
    %4 = tpu.matmul %0, %3, %cst_5 {dimension_numbers = #tpu.dot_dimension_numbers<[1], [0], [0], [1], [0, 0, 1, 1], [], []>} : vector<128x64xbf16>, vector<64x128xbf16>, vector<128x128xf32> -> vector<128x128xf32>
    %5 = arith.mulf %2, %2 : vector<128x128xf32>
    %6 = arith.mulf %4, %4 : vector<128x128xf32>
    %7 = arith.addf %5, %6 : vector<128x128xf32>
    %8 = math.sqrt %7 : vector<128x128xf32>
    %9 = arith.truncf %8 : vector<128x128xf32> to vector<128x128xbf16>
    %c0_6 = arith.constant 0 : index
    %c0_7 = arith.constant 0 : index
    %10 = vector.load %arg4[%c0_6, %c0_7] : memref<128x128xbf16, #tpu.memory_space<vmem>>, vector<128x128xbf16>
    %cst_8 = arith.constant dense<0.000000e+00> : vector<128x128xf32>
    %11 = tpu.matmul %9, %10, %cst_8 {dimension_numbers = #tpu.dot_dimension_numbers<[1], [0], [0], [1], [0, 0, 1, 1], [], []>} : vector<128x128xbf16>, vector<128x128xbf16>, vector<128x128xf32> -> vector<128x128xf32>
    %c0_9 = arith.constant 0 : index
    %c0_10 = arith.constant 0 : index
    %12 = vector.load %arg5[%c0_9, %c0_10] : memref<128x128xf32, #tpu.memory_space<vmem>>, vector<128x128xf32>
    tpu.vector_store %arg5[%c0_9, %c0_10], %11 {strides = array<i32>} : memref<128x128xf32, #tpu.memory_space<vmem>>, vector<128x128xf32>,
    return
  }
  func.func @transform_0(%arg0: i32) -> (i32, i32) {
    %c0_i32 = arith.constant 0 : i32
    %c0_i32_0 = arith.constant 0 : i32
    return %arg0, %c0_i32 : i32, i32
  }
  func.func @transform_1(%arg0: i32) -> (i32, i32) {
    %c0_i32 = arith.constant 0 : i32
    %c0_i32_0 = arith.constant 0 : i32
    %c0_i32_1 = arith.constant 0 : i32
    return %c0_i32, %c0_i32_0 : i32, i32
  }
  func.func @transform_2(%arg0: i32) -> (i32, i32) {
    %c0_i32 = arith.constant 0 : i32
    %c0_i32_0 = arith.constant 0 : i32
    %c0_i32_1 = arith.constant 0 : i32
    return %c0_i32, %c0_i32_0 : i32, i32
  }
  func.func @transform_3(%arg0: i32) -> (i32, i32) {
    %c0_i32 = arith.constant 0 : i32
    %c0_i32_0 = arith.constant 0 : i32
    %c0_i32_1 = arith.constant 0 : i32
    return %c0_i32, %c0_i32_0 : i32, i32
  }
  func.func @transform_4(%arg0: i32) -> (i32, i32) {
    %c0_i32 = arith.constant 0 : i32
    %c0_i32_0 = arith.constant 0 : i32
    return %arg0, %c0_i32 : i32, i32
  }
}

module attributes {stable_mosaic.version = 11 : i64} {
  func.func @_mel_stft_kernel(%arg0: i32, %arg1: memref<128x128xbf16, #tpu.memory_space<vmem>>, %arg2: memref<128x128xbf16, #tpu.memory_space<vmem>>, %arg3: memref<128x128xbf16, #tpu.memory_space<vmem>>, %arg4: memref<128x128xbf16, #tpu.memory_space<vmem>>, %arg5: memref<128x128xf32, #tpu.memory_space<vmem>>) attributes {dimension_semantics = [#tpu.dimension_semantics<parallel>], iteration_bounds = array<i64: 1>, scalar_prefetch = 0 : i64, scratch_operands = 0 : i64, tpu.core_type = #tpu.core_type<tc>, window_params = [{transform_indices = @transform_0, window_bounds = array<i64: 128, 128>}, {pipeline_mode = #tpu.pipeline_mode<synchronous>, transform_indices = @transform_1, window_bounds = array<i64: 128, 128>}, {pipeline_mode = #tpu.pipeline_mode<synchronous>, transform_indices = @transform_2, window_bounds = array<i64: 128, 128>}, {pipeline_mode = #tpu.pipeline_mode<synchronous>, transform_indices = @transform_3, window_bounds = array<i64: 128, 128>}, {transform_indices = @transform_4, window_bounds = array<i64: 128, 128>}]} {
    %c0 = arith.constant 0 : index
    %c0_0 = arith.constant 0 : index
    %0 = vector.load %arg1[%c0, %c0_0] : memref<128x128xbf16, #tpu.memory_space<vmem>>, vector<128x128xbf16>
    %c0_1 = arith.constant 0 : index
    %c0_2 = arith.constant 0 : index
    %1 = vector.load %arg2[%c0_1, %c0_2] : memref<128x128xbf16, #tpu.memory_space<vmem>>, vector<128x128xbf16>
    %cst = arith.constant dense<0.000000e+00> : vector<128x128xf32>
    %2 = tpu.matmul %0, %1, %cst {dimension_numbers = #tpu.dot_dimension_numbers<[1], [0], [0], [1], [0, 0, 1, 1], [], []>} : vector<128x128xbf16>, vector<128x128xbf16>, vector<128x128xf32> -> vector<128x128xf32>
    %c0_3 = arith.constant 0 : index
    %c0_4 = arith.constant 0 : index
    %3 = vector.load %arg3[%c0_3, %c0_4] : memref<128x128xbf16, #tpu.memory_space<vmem>>, vector<128x128xbf16>
    %cst_5 = arith.constant dense<0.000000e+00> : vector<128x128xf32>
    %4 = tpu.matmul %0, %3, %cst_5 {dimension_numbers = #tpu.dot_dimension_numbers<[1], [0], [0], [1], [0, 0, 1, 1], [], []>} : vector<128x128xbf16>, vector<128x128xbf16>, vector<128x128xf32> -> vector<128x128xf32>
    %5 = arith.mulf %2, %2 : vector<128x128xf32>
    %6 = arith.mulf %4, %4 : vector<128x128xf32>
    %7 = arith.addf %5, %6 : vector<128x128xf32>
    %8 = math.sqrt %7 : vector<128x128xf32>
    %9 = arith.truncf %8 : vector<128x128xf32> to vector<128x128xbf16>
    %c0_6 = arith.constant 0 : index
    %c0_7 = arith.constant 0 : index
    %10 = vector.load %arg4[%c0_6, %c0_7] : memref<128x128xbf16, #tpu.memory_space<vmem>>, vector<128x128xbf16>
    %cst_8 = arith.constant dense<0.000000e+00> : vector<128x128xf32>
    %11 = tpu.matmul %9, %10, %cst_8 {dimension_numbers = #tpu.dot_dimension_numbers<[1], [0], [0], [1], [0, 0, 1, 1], [], []>} : vector<128x128xbf16>, vector<128x128xbf16>, vector<128x128xf32> -> vector<128x128xf32>
    %c0_9 = arith.constant 0 : index
    %c0_10 = arith.constant 0 : index
    %12 = vector.load %arg5[%c0_9, %c0_10] : memref<128x128xf32, #tpu.memory_space<vmem>>, vector<128x128xf32>
    tpu.vector_store %arg5[%c0_9, %c0_10], %11 {strides = array<i32>} : memref<128x128xf32, #tpu.memory_space<vmem>>, vector<128x128xf32>,
    return
  }
  func.func @transform_0(%arg0: i32) -> (i32, i32) {
    %c0_i32 = arith.constant 0 : i32
    %c0_i32_0 = arith.constant 0 : i32
    return %arg0, %c0_i32 : i32, i32
  }
  func.func @transform_1(%arg0: i32) -> (i32, i32) {
    %c0_i32 = arith.constant 0 : i32
    %c0_i32_0 = arith.constant 0 : i32
    %c0_i32_1 = arith.constant 0 : i32
    return %c0_i32, %c0_i32_0 : i32, i32
  }
  func.func @transform_2(%arg0: i32) -> (i32, i32) {
    %c0_i32 = arith.constant 0 : i32
    %c0_i32_0 = arith.constant 0 : i32
    %c0_i32_1 = arith.constant 0 : i32
    return %c0_i32, %c0_i32_0 : i32, i32
  }
  func.func @transform_3(%arg0: i32) -> (i32, i32) {
    %c0_i32 = arith.constant 0 : i32
    %c0_i32_0 = arith.constant 0 : i32
    %c0_i32_1 = arith.constant 0 : i32
    return %c0_i32, %c0_i32_0 : i32, i32
  }
  func.func @transform_4(%arg0: i32) -> (i32, i32) {
    %c0_i32 = arith.constant 0 : i32
    %c0_i32_0 = arith.constant 0 : i32
    return %arg0, %c0_i32 : i32, i32
  }
}

</mosaic_0001>

<bundles_post_ra>
// kernel: multiscale_stft_forward.5
= control target key start
LH: loop header
LB: loop body
LE: loop exit
PB: predicated region body
PF: predicated region fallthrough
CT: control target
= control target key end

     0   :  { %s2376_s1 = inlined_call_operand.vmem [shape: bf16[256,256], index: 1, kind: input, shape index: {}]   ;;  %s2377_s2 = inlined_call_operand.vmem [shape: bf16[256,256], index: 2, kind: input, shape index: {}]   ;;  %s2378_s0 = inlined_call_operand.vmem [shape: bf16[128,256], index: 0, kind: input, shape index: {}]   ;;  %s2379_s3 = inlined_call_operand.vmem [shape: bf16[256,128], index: 3, kind: input, shape index: {}]   ;;  %s2380_s4 = inlined_call_operand.vmem [shape: f32[128,128], index: 4, kind: output, shape index: {}]  }
   0x1   :  { %v1481_v0 = vld [vmem:[%s2376_s1 + $0x4] ss:$8 sps:$4 sm:$0xff]   ;;  %v1485_v2 = vld [vmem:[%s2376_s1] ss:$8 sps:$4 sm:$0xff]   ;;  %v1487_v4 = vld [vmem:[%s2376_s1 + $0x14] ss:$8 sps:$4 sm:$0xff]  }
   0x2   :  { %v1483_v1 = vld [vmem:[%s2377_s2 + $0x4] ss:$8 sps:$4 sm:$0xff]   ;;  %306 = vmatprep.subr.bf16.mxu0 %v1481_v0  ;;  %v1486_v3 = vld [vmem:[%s2377_s2] ss:$8 sps:$4 sm:$0xff]   ;;  %v1489_v5 = vld [vmem:[%s2377_s2 + $0x14] ss:$8 sps:$4 sm:$0xff]  }
   0x3   :  { %611 = vmatprep.subr.bf16.mxu1 %v1483_v1  ;;  %307 = vmatpush1.bf16.msra.mxu0 %v1485_v2  ;;  %v1491_v6 = vld [vmem:[%s2376_s1 + $0x10] ss:$8 sps:$4 sm:$0xff]   ;;  %v1493_v8 = vld [vmem:[%s2376_s1 + $0x24] ss:$8 sps:$4 sm:$0xff]   ;;  %v1497_v10 = vld [vmem:[%s2376_s1 + $0x20] ss:$8 sps:$4 sm:$0xff]  }
   0x4   :  { %612 = vmatpush1.bf16.msra.mxu1 %v1486_v3  ;;  %308 = vmatprep.subr.bf16.mxu0 %v1487_v4  ;;  %v1492_v7 = vld [vmem:[%s2377_s2 + $0x10] ss:$8 sps:$4 sm:$0xff]   ;;  %v1495_v9 = vld [vmem:[%s2377_s2 + $0x24] ss:$8 sps:$4 sm:$0xff]   ;;  %v1498_v11 = vld [vmem:[%s2377_s2 + $0x20] ss:$8 sps:$4 sm:$0xff]  }
   0x5   :  { %613 = vmatprep.subr.bf16.mxu1 %v1489_v5  ;;  %v1499_v12 = vld [vmem:[%s2376_s1 + $0x34] ss:$8 sps:$4 sm:$0xff]   ;;  %v1503_v14 = vld [vmem:[%s2376_s1 + $0x30] ss:$8 sps:$4 sm:$0xff]   ;;  %v1505_v16 = vld [vmem:[%s2376_s1 + $0x44] ss:$8 sps:$4 sm:$0xff]  }
   0x6   :  { %v1501_v13 = vld [vmem:[%s2377_s2 + $0x34] ss:$8 sps:$4 sm:$0xff]   ;;  %v1504_v15 = vld [vmem:[%s2377_s2 + $0x30] ss:$8 sps:$4 sm:$0xff]   ;;  %v1507_v17 = vld [vmem:[%s2377_s2 + $0x44] ss:$8 sps:$4 sm:$0xff]  }
   0x7   :  { %309 = vmatpush1.bf16.msra.mxu0 %v1491_v6  ;;  %v1509_v18 = vld [vmem:[%s2376_s1 + $0x40] ss:$8 sps:$4 sm:$0xff]   ;;  %v1511_v20 = vld [vmem:[%s2376_s1 + $0x54] ss:$8 sps:$4 sm:$0xff]   ;;  %v1515_v22 = vld [vmem:[%s2376_s1 + $0x50] ss:$8 sps:$4 sm:$0xff]  }
   0x8   :  { %614 = vmatpush1.bf16.msra.mxu1 %v1492_v7  ;;  %310 = vmatprep.subr.bf16.mxu0 %v1493_v8  ;;  %v1510_v19 = vld [vmem:[%s2377_s2 + $0x40] ss:$8 sps:$4 sm:$0xff]   ;;  %v1513_v21 = vld [vmem:[%s2377_s2 + $0x54] ss:$8 sps:$4 sm:$0xff]   ;;  %v1516_v23 = vld [vmem:[%s2377_s2 + $0x50] ss:$8 sps:$4 sm:$0xff]  }
   0x9   :  { %615 = vmatprep.subr.bf16.mxu1 %v1495_v9  ;;  %v1517_v24 = vld [vmem:[%s2376_s1 + $0x64] ss:$8 sps:$4 sm:$0xff]   ;;  %v1521_v26 = vld [vmem:[%s2376_s1 + $0x60] ss:$8 sps:$4 sm:$0xff]   ;;  %v1523_v28 = vld [vmem:[%s2376_s1 + $0x74] ss:$8 sps:$4 sm:$0xff]  }
   0xa   :  { %v1519_v25 = vld [vmem:[%s2377_s2 + $0x64] ss:$8 sps:$4 sm:$0xff]   ;;  %v1522_v27 = vld [vmem:[%s2377_s2 + $0x60] ss:$8 sps:$4 sm:$0xff]   ;;  %v1525_v29 = vld [vmem:[%s2377_s2 + $0x74] ss:$8 sps:$4 sm:$0xff]  }
   0xb   :  { %311 = vmatpush1.bf16.msra.mxu0 %v1497_v10  ;;  %v1527_v30 = vld [vmem:[%s2376_s1 + $0x70] ss:$8 sps:$4 sm:$0xff]   ;;  %v1529_v32 = vld [vmem:[%s2376_s1 + $0x84] ss:$8 sps:$4 sm:$0xff]   ;;  %v1533_v34 = vld [vmem:[%s2376_s1 + $0x80] ss:$8 sps:$4 sm:$0xff]  }
   0xc   :  { %616 = vmatpush1.bf16.msra.mxu1 %v1498_v11  ;;  %312 = vmatprep.subr.bf16.mxu0 %v1499_v12  ;;  %v1528_v31 = vld [vmem:[%s2377_s2 + $0x70] ss:$8 sps:$4 sm:$0xff]   ;;  %v1531_v33 = vld [vmem:[%s2377_s2 + $0x84] ss:$8 sps:$4 sm:$0xff]   ;;  %v1534_v35 = vld [vmem:[%s2377_s2 + $0x80] ss:$8 sps:$4 sm:$0xff]  }
   0xd   :  { %617 = vmatprep.subr.bf16.mxu1 %v1501_v13  ;;  %v1535_v36 = vld [vmem:[%s2376_s1 + $0x94] ss:$8 sps:$4 sm:$0xff]   ;;  %v1539_v38 = vld [vmem:[%s2376_s1 + $0x90] ss:$8 sps:$4 sm:$0xff]   ;;  %v1541_v40 = vld [vmem:[%s2376_s1 + $0xa4] ss:$8 sps:$4 sm:$0xff]  }
   0xe   :  { %v1537_v37 = vld [vmem:[%s2377_s2 + $0x94] ss:$8 sps:$4 sm:$0xff]   ;;  %v1540_v39 = vld [vmem:[%s2377_s2 + $0x90] ss:$8 sps:$4 sm:$0xff]   ;;  %v1543_v41 = vld [vmem:[%s2377_s2 + $0xa4] ss:$8 sps:$4 sm:$0xff]  }
   0xf   :  { %313 = vmatpush1.bf16.msra.mxu0 %v1503_v14  ;;  %v1545_v42 = vld [vmem:[%s2376_s1 + $0xa0] ss:$8 sps:$4 sm:$0xff]   ;;  %v1547_v44 = vld [vmem:[%s2376_s1 + $0xb4] ss:$8 sps:$4 sm:$0xff]   ;;  %v1551_v46 = vld [vmem:[%s2376_s1 + $0xb0] ss:$8 sps:$4 sm:$0xff]  }
  0x10   :  { %618 = vmatpush1.bf16.msra.mxu1 %v1504_v15  ;;  %314 = vmatprep.subr.bf16.mxu0 %v1505_v16  ;;  %v1546_v43 = vld [vmem:[%s2377_s2 + $0xa0] ss:$8 sps:$4 sm:$0xff]   ;;  %v1549_v45 = vld [vmem:[%s2377_s2 + $0xb4] ss:$8 sps:$4 sm:$0xff]   ;;  %v1552_v47 = vld [vmem:[%s2377_s2 + $0xb0] ss:$8 sps:$4 sm:$0xff]  }
  0x11   :  { %619 = vmatprep.subr.bf16.mxu1 %v1507_v17  ;;  %v1579_v48 = vld [vmem:[%s2378_s0 + $0x4] ss:$8 sps:$4 sm:$0xff]   ;;  %v1557_v51 = vld [vmem:[%s2376_s1 + $0xc0] ss:$8 sps:$4 sm:$0xff]   ;;  %v1559_v53 = vld [vmem:[%s2376_s1 + $0xd4] ss:$8 sps:$4 sm:$0xff]  }
  0x12   :  { %v1553_v49 = vld [vmem:[%s2376_s1 + $0xc4] ss:$8 sps:$4 sm:$0xff]   ;;  %338 = vmatprep.mubr.bf16.mxu0 %v1579_v48  ;;  %643 = vmatprep.mubr.bf16.mxu1 %v1579_v48  ;;  %v1558_v52 = vld [vmem:[%s2377_s2 + $0xc0] ss:$8 sps:$4 sm:$0xff]   ;;  %v1561_v54 = vld [vmem:[%s2377_s2 + $0xd4] ss:$8 sps:$4 sm:$0xff]  }
  0x13   :  { %315 = vmatpush1.bf16.msra.mxu0 %v1509_v18  ;;  %v1555_v50 = vld [vmem:[%s2377_s2 + $0xc4] ss:$8 sps:$4 sm:$0xff]   ;;  %v1563_v55 = vld [vmem:[%s2376_s1 + $0xd0] ss:$8 sps:$4 sm:$0xff]   ;;  %v1569_v59 = vld [vmem:[%s2376_s1 + $0xe0] ss:$8 sps:$4 sm:$0xff]  }
  0x14   :  { %620 = vmatpush1.bf16.msra.mxu1 %v1510_v19  ;;  %316 = vmatprep.subr.bf16.mxu0 %v1511_v20  ;;  %v1564_v56 = vld [vmem:[%s2377_s2 + $0xd0] ss:$8 sps:$4 sm:$0xff]   ;;  %v1565_v57 = vld [vmem:[%s2376_s1 + $0xe4] ss:$8 sps:$4 sm:$0xff]   ;;  %v1570_v60 = vld [vmem:[%s2377_s2 + $0xe0] ss:$8 sps:$4 sm:$0xff]  }
  0x15   :  { %621 = vmatprep.subr.bf16.mxu1 %v1513_v21  ;;  %v1567_v58 = vld [vmem:[%s2377_s2 + $0xe4] ss:$8 sps:$4 sm:$0xff]   ;;  %v1571_v61 = vld [vmem:[%s2376_s1 + $0xf4] ss:$8 sps:$4 sm:$0xff]   ;;  %v1575_v63 = vld [vmem:[%s2376_s1 + $0xf0] ss:$8 sps:$4 sm:$0xff]  }
  0x16   :  { %v1573_v62 = vld [vmem:[%s2377_s2 + $0xf4] ss:$8 sps:$4 sm:$0xff]   ;;  %v1576_v0 = vld [vmem:[%s2377_s2 + $0xf0] ss:$8 sps:$4 sm:$0xff]   ;;  %v1601_v1 = vld [vmem:[%s2379_s3 + $0x40] sm:$0xff]  }
  0x17   :  { %317 = vmatpush1.bf16.msra.mxu0 %v1515_v22  ;;  %v1577_v2 = vld [vmem:[%s2378_s0] ss:$8 sps:$4 sm:$0xff]   ;;  %v1580_v3 = vld [vmem:[%s2378_s0 + $0x14] ss:$8 sps:$4 sm:$0xff]   ;;  %v1582_v7 = vld [vmem:[%s2378_s0 + $0x10] ss:$8 sps:$4 sm:$0xff]  }
  0x18   :  { %622 = vmatpush1.bf16.msra.mxu1 %v1516_v23  ;;  %318 = vmatprep.subr.bf16.mxu0 %v1517_v24  ;;  %v1602_v4 = vld [vmem:[%s2379_s3] sm:$0xff]   ;;  %v1603_v5 = vld [vmem:[%s2379_s3 + $0x48] sm:$0xff]   ;;  %v1586_v10 = vld [vmem:[%s2378_s0 + $0x34] ss:$8 sps:$4 sm:$0xff]  }
  0x19   :  { %623 = vmatprep.subr.bf16.mxu1 %v1519_v25  ;;  %v1604_v6 = vld [vmem:[%s2379_s3 + $0x8] sm:$0xff]   ;;  %v1588_v11 = vld [vmem:[%s2378_s0 + $0x30] ss:$8 sps:$4 sm:$0xff]   ;;  %v1592_v14 = vld [vmem:[%s2378_s0 + $0x54] ss:$8 sps:$4 sm:$0xff]  }
  0x1a   :  { %v1583_v8 = vld [vmem:[%s2378_s0 + $0x24] ss:$8 sps:$4 sm:$0xff]   ;;  %v1585_v9 = vld [vmem:[%s2378_s0 + $0x20] ss:$8 sps:$4 sm:$0xff]   ;;  %v1594_v15 = vld [vmem:[%s2378_s0 + $0x50] ss:$8 sps:$4 sm:$0xff]  }
  0x1b   :  { %319 = vmatpush1.bf16.msra.mxu0 %v1521_v26  ;;  %v1589_v12 = vld [vmem:[%s2378_s0 + $0x44] ss:$8 sps:$4 sm:$0xff]   ;;  %v1591_v13 = vld [vmem:[%s2378_s0 + $0x40] ss:$8 sps:$4 sm:$0xff]   ;;  %v1598_v18 = vld [vmem:[%s2378_s0 + $0x74] ss:$8 sps:$4 sm:$0xff]  }
  0x1c   :  { %624 = vmatpush1.bf16.msra.mxu1 %v1522_v27  ;;  %320 = vmatprep.subr.bf16.mxu0 %v1523_v28  ;;  %v1595_v16 = vld [vmem:[%s2378_s0 + $0x64] ss:$8 sps:$4 sm:$0xff]   ;;  %v1597_v17 = vld [vmem:[%s2378_s0 + $0x60] ss:$8 sps:$4 sm:$0xff]   ;;  %v1600_v19 = vld [vmem:[%s2378_s0 + $0x70] ss:$8 sps:$4 sm:$0xff]  }
  0x1d   :  { %625 = vmatprep.subr.bf16.mxu1 %v1525_v29  ;;  %v1605_v20 = vld [vmem:[%s2379_s3 + $0x50] sm:$0xff]   ;;  %v1607_v22 = vld [vmem:[%s2379_s3 + $0x58] sm:$0xff]   ;;  %v1609_v24 = vld [vmem:[%s2379_s3 + $0x60] sm:$0xff]  }
  0x1e   :  { %v1606_v21 = vld [vmem:[%s2379_s3 + $0x10] sm:$0xff]   ;;  %v1608_v23 = vld [vmem:[%s2379_s3 + $0x18] sm:$0xff]   ;;  %v1610_v25 = vld [vmem:[%s2379_s3 + $0x20] sm:$0xff]  }
  0x1f   :  { %321 = vmatpush1.bf16.msra.mxu0 %v1527_v30  ;;  %v1611_v26 = vld [vmem:[%s2379_s3 + $0x68] sm:$0xff]   ;;  %v1613_v28 = vld [vmem:[%s2379_s3 + $0x70] sm:$0xff]   ;;  %v1615_v30 = vld [vmem:[%s2379_s3 + $0x78] sm:$0xff]  }
  0x20   :  { %626 = vmatpush1.bf16.msra.mxu1 %v1528_v31  ;;  %322 = vmatprep.subr.bf16.mxu0 %v1529_v32  ;;  %v1612_v27 = vld [vmem:[%s2379_s3 + $0x28] sm:$0xff]   ;;  %v1614_v29 = vld [vmem:[%s2379_s3 + $0x30] sm:$0xff]   ;;  %v1616_v31 = vld [vmem:[%s2379_s3 + $0x38] sm:$0xff]  }
  0x21   :  { %627 = vmatprep.subr.bf16.mxu1 %v1531_v33 }
  0x23   :  { %323 = vmatpush1.bf16.msra.mxu0 %v1533_v34 }
  0x24   :  { %628 = vmatpush1.bf16.msra.mxu1 %v1534_v35  ;;  %324 = vmatprep.subr.bf16.mxu0 %v1535_v36 }
  0x25   :  { %629 = vmatprep.subr.bf16.mxu1 %v1537_v37 }
  0x27   :  { %325 = vmatpush1.bf16.msra.mxu0 %v1539_v38 }
  0x28   :  { %630 = vmatpush1.bf16.msra.mxu1 %v1540_v39  ;;  %326 = vmatprep.subr.bf16.mxu0 %v1541_v40 }
  0x29   :  { %631 = vmatprep.subr.bf16.mxu1 %v1543_v41 }
  0x2b   :  { %327 = vmatpush1.bf16.msra.mxu0 %v1545_v42 }
  0x2c   :  { %632 = vmatpush1.bf16.msra.mxu1 %v1546_v43  ;;  %328 = vmatprep.subr.bf16.mxu0 %v1547_v44 }
  0x2d   :  { %633 = vmatprep.subr.bf16.mxu1 %v1549_v45 }
  0x2f   :  { %329 = vmatpush1.bf16.msra.mxu0 %v1551_v46 }
  0x30   :  { %634 = vmatpush1.bf16.msra.mxu1 %v1552_v47  ;;  %330 = vmatprep.subr.bf16.mxu0 %v1553_v49 }
  0x31   :  { %635 = vmatprep.subr.bf16.mxu1 %v1555_v50 }
  0x33   :  { %331 = vmatpush1.bf16.msra.mxu0 %v1557_v51 }
  0x34   :  { %636 = vmatpush1.bf16.msra.mxu1 %v1558_v52  ;;  %332 = vmatprep.subr.bf16.mxu0 %v1559_v53 }
  0x35   :  { %637 = vmatprep.subr.bf16.mxu1 %v1561_v54 }
  0x37   :  { %333 = vmatpush1.bf16.msra.mxu0 %v1563_v55 }
  0x38   :  { %638 = vmatpush1.bf16.msra.mxu1 %v1564_v56  ;;  %334 = vmatprep.subr.bf16.mxu0 %v1565_v57 }
  0x39   :  { %639 = vmatprep.subr.bf16.mxu1 %v1567_v58 }
  0x3b   :  { %335 = vmatpush1.bf16.msra.mxu0 %v1569_v59 }
  0x3c   :  { %640 = vmatpush1.bf16.msra.mxu1 %v1570_v60  ;;  %336 = vmatprep.subr.bf16.mxu0 %v1571_v61 }
  0x3d   :  { %641 = vmatprep.subr.bf16.mxu1 %v1573_v62 }
  0x3f   :  { %337 = vmatpush1.bf16.msra.mxu0 %v1575_v63 }
  0x40   :  { %642 = vmatpush1.bf16.msra.mxu1 %v1576_v0  ;;  %1401 = vmatprep.subr.bf16.mxu0 %v1601_v1 }
  0x41   :  { %1465 = vmatprep.subr.bf16.mxu1 %v1601_v1 }
  0x42   :  { %339 = vmatmul.mubr.bf16.vlgmr.msra.gmra.mrb[0].mxu0 %v1577_v2 }
  0x43   :  { %644 = vmatmul.mubr.bf16.vlgmr.msra.gmra.mrb[0].mxu1 %v1577_v2  ;;  %348 = vmatprep.mubr.bf16.mxu0 %v1580_v3 }
  0x44   :  { %653 = vmatprep.mubr.bf16.mxu1 %v1580_v3  ;;  %1402 = vmatpush3.bf16.msra.mxu0 %v1602_v4 }
  0x45   :  { %1473 = vmatpush3.bf16.msra.mxu1 %v1602_v4  ;;  %1403 = vmatprep.subr.bf16.mxu0 %v1603_v5 }
  0x46   :  { %1466 = vmatprep.subr.bf16.mxu1 %v1603_v5 }
  0x48   :  { %1404 = vmatpush3.bf16.msra.mxu0 %v1604_v6 }
  0x49   :  { %1474 = vmatpush3.bf16.msra.mxu1 %v1604_v6  ;;  %1405 = vmatprep.subr.bf16.mxu0 %v1605_v20 }
  0x4a   :  { %349 = vmatmul.mubr.bf16.gmra.mrb[4].mxu0 %v1582_v7  ;;  %1467 = vmatprep.subr.bf16.mxu1 %v1605_v20 }
  0x4b   :  { %654 = vmatmul.mubr.bf16.gmra.mrb[4].mxu1 %v1582_v7  ;;  %358 = vmatprep.mubr.bf16.mxu0 %v1583_v8 }
  0x4c   :  { %663 = vmatprep.mubr.bf16.mxu1 %v1583_v8  ;;  %1406 = vmatpush3.bf16.msra.mxu0 %v1606_v21 }
  0x4d   :  { %1475 = vmatpush3.bf16.msra.mxu1 %v1606_v21  ;;  %1407 = vmatprep.subr.bf16.mxu0 %v1607_v22 }
  0x4e   :  { %1468 = vmatprep.subr.bf16.mxu1 %v1607_v22 }
  0x50   :  { %1408 = vmatpush3.bf16.msra.mxu0 %v1608_v23 }
  0x51   :  { %1476 = vmatpush3.bf16.msra.mxu1 %v1608_v23  ;;  %1409 = vmatprep.subr.bf16.mxu0 %v1609_v24 }
  0x52   :  { %359 = vmatmul.mubr.bf16.gmra.mrb[8].mxu0 %v1585_v9  ;;  %1469 = vmatprep.subr.bf16.mxu1 %v1609_v24 }
  0x53   :  { %664 = vmatmul.mubr.bf16.gmra.mrb[8].mxu1 %v1585_v9  ;;  %368 = vmatprep.mubr.bf16.mxu0 %v1586_v10 }
  0x54   :  { %673 = vmatprep.mubr.bf16.mxu1 %v1586_v10  ;;  %1410 = vmatpush3.bf16.msra.mxu0 %v1610_v25 }
  0x55   :  { %1477 = vmatpush3.bf16.msra.mxu1 %v1610_v25  ;;  %1411 = vmatprep.subr.bf16.mxu0 %v1611_v26 }
  0x56   :  { %1470 = vmatprep.subr.bf16.mxu1 %v1611_v26 }
  0x58   :  { %1412 = vmatpush3.bf16.msra.mxu0 %v1612_v27 }
  0x59   :  { %1478 = vmatpush3.bf16.msra.mxu1 %v1612_v27  ;;  %1413 = vmatprep.subr.bf16.mxu0 %v1613_v28 }
  0x5a   :  { %369 = vmatmul.mubr.bf16.gmra.mrb[12].mxu0 %v1588_v11  ;;  %1471 = vmatprep.subr.bf16.mxu1 %v1613_v28 }
  0x5b   :  { %674 = vmatmul.mubr.bf16.gmra.mrb[12].mxu1 %v1588_v11  ;;  %378 = vmatprep.mubr.bf16.mxu0 %v1589_v12 }
  0x5c   :  { %683 = vmatprep.mubr.bf16.mxu1 %v1589_v12  ;;  %1414 = vmatpush3.bf16.msra.mxu0 %v1614_v29 }
  0x5d   :  { %1479 = vmatpush3.bf16.msra.mxu1 %v1614_v29  ;;  %1415 = vmatprep.subr.bf16.mxu0 %v1615_v30 }
  0x5e   :  { %1472 = vmatprep.subr.bf16.mxu1 %v1615_v30 }
  0x60   :  { %1416 = vmatpush3.bf16.msra.mxu0 %v1616_v31 }
  0x61   :  { %1480 = vmatpush3.bf16.msra.mxu1 %v1616_v31 }
  0x62   :  { %379 = vmatmul.mubr.bf16.gmra.mrb[16].mxu0 %v1591_v13 }
  0x63   :  { %684 = vmatmul.mubr.bf16.gmra.mrb[16].mxu1 %v1591_v13  ;;  %388 = vmatprep.mubr.bf16.mxu0 %v1592_v14 }
  0x64   :  { %693 = vmatprep.mubr.bf16.mxu1 %v1592_v14 }
  0x6a   :  { %389 = vmatmul.mubr.bf16.gmra.mrb[20].mxu0 %v1594_v15 }
  0x6b   :  { %694 = vmatmul.mubr.bf16.gmra.mrb[20].mxu1 %v1594_v15  ;;  %398 = vmatprep.mubr.bf16.mxu0 %v1595_v16 }
  0x6c   :  { %703 = vmatprep.mubr.bf16.mxu1 %v1595_v16 }
  0x72   :  { %399 = vmatmul.mubr.bf16.gmra.mrb[24].mxu0 %v1597_v17 }
  0x73   :  { %704 = vmatmul.mubr.bf16.gmra.mrb[24].mxu1 %v1597_v17  ;;  %408 = vmatprep.mubr.bf16.mxu0 %v1598_v18 }
  0x74   :  { %713 = vmatprep.mubr.bf16.mxu1 %v1598_v18 }
  0x7a   :  { %409 = vmatmul.mubr.bf16.gmra.mrb[28].mxu0 %v1600_v19 }
  0x7b   :  { %714 = vmatmul.mubr.bf16.gmra.mrb[28].mxu1 %v1600_v19 }
 0x115   :  { %v340_v32 = vpop.f32.mrb[0].mxu0 }
 0x116   :  { %v645_v33 = vpop.f32.mrb[0].mxu1  ;;  %v724_v34 = vmul.f32 %v340_v32, %v340_v32  ;;  %v342_v36 = vpop.f32.mrb[1].mxu0 }
 0x117   :  { %v756_v35 = vmul.f32 %v645_v33, %v645_v33  ;;  %v647_v37 = vpop.f32.mrb[1].mxu1  ;;  %v725_v38 = vmul.f32 %v342_v36, %v342_v36  ;;  %v344_v40 = vpop.f32.mrb[2].mxu0 }
 0x118   :  { %v757_v39 = vmul.f32 %v647_v37, %v647_v37  ;;  %v649_v41 = vpop.f32.mrb[2].mxu1  ;;  %v726_v43 = vmul.f32 %v344_v40, %v344_v40  ;;  %v346_v45 = vpop.f32.mrb[3].mxu0 }
 0x119   :  { %v1994_v42 = vadd.f32 %v756_v35, %v724_v34  ;;  %v758_v44 = vmul.f32 %v649_v41, %v649_v41  ;;  %v651_v46 = vpop.f32.mrb[3].mxu1  ;;  %v727_v48 = vmul.f32 %v346_v45, %v346_v45 }
 0x11a   :  { %v1996_v47 = vadd.f32 %v757_v39, %v725_v38  ;;  %v759_v49 = vmul.f32 %v651_v46, %v651_v46 }
 0x11b   :  { %1617 = vrsqrt.f32 %v1994_v42  ;;  %v1999_v50 = vadd.f32 %v758_v44, %v726_v43  ;;  %vm822_vm0 = vcmp.eq.f32.partialorder %v1994_v42, inf  ;;  %vm824_vm3 = vcmp.eq.f32.partialorder %v1994_v42, 0.0 }
 0x11c   :  { %1619 = vrsqrt.f32 %v1996_v47  ;;  %v2002_v51 = vadd.f32 %v759_v49, %v727_v48  ;;  %vm829_vm1 = vcmp.eq.f32.partialorder %v1996_v47, inf  ;;  %vm831_vm2 = vcmp.eq.f32.partialorder %v1996_v47, 0.0 }
 0x11d   :  { %1621 = vrsqrt.f32 %v1999_v50  ;;  %v350_v52 = vpop.f32.mrb[4].mxu0  ;;  %v832_v7 = vand.u32 2147483648, %v1996_v47  ;;  %v825_v8 = vand.u32 2147483648, %v1994_v42  ;;  %vm836_vm5 = vcmp.eq.f32.partialorder %v1999_v50, inf }
 0x11e   :  { %1623 = vrsqrt.f32 %v2002_v51  ;;  %v655_v53 = vpop.f32.mrb[4].mxu1  ;;  %v728_v54 = vmul.f32 %v350_v52, %v350_v52  ;;  %v352_v56 = vpop.f32.mrb[5].mxu0  ;;  %vm843_vm4 = vcmp.eq.f32.partialorder %v2002_v51, inf  ;;  %vm845_vm6 = vcmp.eq.f32.partialorder %v2002_v51, 0.0 }
 0x11f   :  { %v760_v55 = vmul.f32 %v655_v53, %v655_v53  ;;  %v657_v57 = vpop.f32.mrb[5].mxu1  ;;  %v729_v58 = vmul.f32 %v352_v56, %v352_v56  ;;  %v354_v60 = vpop.f32.mrb[6].mxu0  ;;  %v846_v11 = vand.u32 2147483648, %v2002_v51  ;;  %vm838_vm7 = vcmp.eq.f32.partialorder %v1999_v50, 0.0 }
 0x120   :  { %v761_v59 = vmul.f32 %v657_v57, %v657_v57  ;;  %v659_v61 = vpop.f32.mrb[6].mxu1  ;;  %v730_v63 = vmul.f32 %v354_v60, %v354_v60  ;;  %v356_v1 = vpop.f32.mrb[7].mxu0  ;;  %v839_v16 = vand.u32 2147483648, %v1999_v50 }
 0x121   :  { %v2007_v62 = vadd.f32 %v760_v55, %v728_v54  ;;  %v762_v0 = vmul.f32 %v659_v61, %v659_v61  ;;  %v661_v2 = vpop.f32.mrb[7].mxu1  ;;  %v731_v4 = vmul.f32 %v356_v1, %v356_v1 }
 0x122   :  { %v2010_v3 = vadd.f32 %v761_v59, %v729_v58  ;;  %v763_v5 = vmul.f32 %v661_v2, %v661_v2 }
 0x123   :  { %1625 = vrsqrt.f32 %v2007_v62  ;;  %v2014_v6 = vadd.f32 %v762_v0, %v730_v63  ;;  %vm850_vm8 = vcmp.eq.f32.partialorder %v2007_v62, inf  ;;  %v853_v24 = vand.u32 2147483648, %v2007_v62 }
 0x124   :  { %1627 = vrsqrt.f32 %v2010_v3  ;;  %v2020_v9 = vadd.f32 %v763_v5, %v731_v4  ;;  %v860_v17 = vand.u32 2147483648, %v2010_v3  ;;  %vm857_vm9 = vcmp.eq.f32.partialorder %v2010_v3, inf }
 0x125   :  { %v1618_v10 = vpop.eup %1617  ;;  %1629 = vrsqrt.f32 %v2014_v6  ;;  %v360_v13 = vpop.f32.mrb[8].mxu0  ;;  %vm859_vm10 = vcmp.eq.f32.partialorder %v2010_v3, 0.0  ;;  %vm852_vm11 = vcmp.eq.f32.partialorder %v2007_v62, 0.0  ;;  %vm864_vm12 = vcmp.eq.f32.partialorder %v2014_v6, inf }
 0x126   :  { %v1620_v12 = vpop.eup %1619  ;;  %1631 = vrsqrt.f32 %v2020_v9  ;;  %v665_v14 = vpop.f32.mrb[8].mxu1  ;;  %v821_v15 = vmul.f32 %v1618_v10, %v1994_v42  ;;  %v732_v19 = vmul.f32 %v360_v13, %v360_v13  ;;  %v874_v41 = vand.u32 2147483648, %v2020_v9 }
 0x127   :  { %v1622_v18 = vpop.eup %1621  ;;  %v764_v20 = vmul.f32 %v665_v14, %v665_v14  ;;  %v362_v21 = vpop.f32.mrb[9].mxu0  ;;  %v828_v23 = vmul.f32 %v1620_v12, %v1996_v47  ;;  %vm871_vm13 = vcmp.eq.f32.partialorder %v2020_v9, inf  ;;  %vm873_vm14 = vcmp.eq.f32.partialorder %v2020_v9, 0.0 }
 0x128   :  { %v667_v22 = vpop.f32.mrb[9].mxu1  ;;  %v1624_v25 = vpop.eup %1623  ;;  %v733_v26 = vmul.f32 %v362_v21, %v362_v21  ;;  %v823_v30 = vsel %vm822_vm0, %v1994_v42, %v821_v15  ;;  %v835_v31 = vmul.f32 %v1622_v18, %v1999_v50  ;;  %vm866_vm15 = vcmp.eq.f32.partialorder %v2014_v6, 0.0 }
 0x129   :  { %v765_v27 = vmul.f32 %v667_v22, %v667_v22  ;;  %v364_v28 = vpop.f32.mrb[10].mxu0  ;;  %v669_v29 = vpop.f32.mrb[10].mxu1  ;;  %v2040_v32 = vadd.f32 %v764_v20, %v732_v19  ;;  %v830_v37 = vsel %vm829_vm1, %v1996_v47, %v828_v23  ;;  %v842_v45 = vmul.f32 %v1624_v25, %v2002_v51 }
 0x12a   :  { %v734_v33 = vmul.f32 %v364_v28, %v364_v28  ;;  %v766_v34 = vmul.f32 %v669_v29, %v669_v29  ;;  %v366_v35 = vpop.f32.mrb[11].mxu0  ;;  %v671_v36 = vpop.f32.mrb[11].mxu1  ;;  %v833_v44 = vsel %vm831_vm2, %v832_v7, %v830_v37  ;;  %v826_v48 = vsel %vm824_vm3, %v825_v8, %v823_v30 }
 0x12b   :  { %v2045_v38 = vadd.f32 %v765_v27, %v733_v26  ;;  %v735_v39 = vmul.f32 %v366_v35, %v366_v35  ;;  %v767_v40 = vmul.f32 %v671_v36, %v671_v36  ;;  %1633 = vrsqrt.f32 %v2040_v32 }
 0x12c   :  { %v2050_v43 = vadd.f32 %v766_v34, %v734_v33  ;;  %v837_v49 = vsel %vm836_vm5, %v1999_v50, %v835_v31  ;;  %v844_v52 = vsel %vm843_vm4, %v2002_v51, %v842_v45  ;;  %v867_v21 = vand.u32 2147483648, %v2014_v6 }
 0x12d   :  { %1635 = vrsqrt.f32 %v2045_v38  ;;  %v2058_v46 = vadd.f32 %v767_v40, %v735_v39  ;;  %v1626_v47 = vpop.eup %1625  ;;  %v840_v53 = vsel %vm838_vm7, %v839_v16, %v837_v49  ;;  %v370_v54 = vpop.f32.mrb[12].mxu0  ;;  %v847_v56 = vsel %vm845_vm6, %v846_v11, %v844_v52 }
 0x12e   :  { %1637 = vrsqrt.f32 %v2050_v43  ;;  %v1628_v42 = vpop.eup %1627  ;;  %v675_v55 = vpop.f32.mrb[12].mxu1  ;;  %v1044_v57 = vpack.c.bf16 %v840_v53, %v826_v48  ;;  %v849_v58 = vmul.f32 %v1626_v47, %v2007_v62  ;;  %v736_v60 = vmul.f32 %v370_v54, %v370_v54 }
 0x12f   :  { %1639 = vrsqrt.f32 %v2058_v46  ;;  %v1630_v59 = vpop.eup %1629  ;;  %v768_v61 = vmul.f32 %v675_v55, %v675_v55  ;;  %v372_v50 = vpop.f32.mrb[13].mxu0  ;;  %v1045_v0 = vpack.c.bf16 %v847_v56, %v833_v44  ;;  %v856_v1 = vmul.f32 %v1628_v42, %v2010_v3 }
 0x130   :  { %v677_v63 = vpop.f32.mrb[13].mxu1  ;;  %v1632_v2 = vpop.eup %1631  ;;  %v737_v4 = vmul.f32 %v372_v50, %v372_v50  ;;  %v851_v51 = vsel %vm850_vm8, %v2007_v62, %v849_v58  ;;  %v863_v10 = vmul.f32 %v1630_v59, %v2014_v6  ;;  %vm885_vm0 = vcmp.eq.f32.partialorder %v2045_v38, inf }
 0x131   :  { %v769_v5 = vmul.f32 %v677_v63, %v677_v63  ;;  %v374_v7 = vpop.f32.mrb[14].mxu0  ;;  %v679_v8 = vpop.f32.mrb[14].mxu1  ;;  %v2083_v11 = vadd.f32 %v768_v61, %v736_v60  ;;  %1220 = vmatprep.mubr.bf16.mxu0 %v1045_v0  ;;  %v858_v16 = vsel %vm857_vm9, %v2010_v3, %v856_v1  ;;  %v870_v25 = vmul.f32 %v1632_v2, %v2020_v9 }
 0x132   :  { %v738_v12 = vmul.f32 %v374_v7, %v374_v7  ;;  %v770_v13 = vmul.f32 %v679_v8, %v679_v8  ;;  %v376_v14 = vpop.f32.mrb[15].mxu0  ;;  %v681_v15 = vpop.f32.mrb[15].mxu1  ;;  %1221 = vmatmul.mubr.bf16.vlgmr.msra.gmra.mrb[32].mxu0 %v1044_v57  ;;  %v861_v23 = vsel %vm859_vm10, %v860_v17, %v858_v16  ;;  %v854_v27 = vsel %vm852_vm11, %v853_v24, %v851_v51 }
 0x133   :  { %v2088_v18 = vadd.f32 %v769_v5, %v737_v4  ;;  %v739_v19 = vmul.f32 %v376_v14, %v376_v14  ;;  %v771_v20 = vmul.f32 %v681_v15, %v681_v15  ;;  %1641 = vrsqrt.f32 %v2083_v11 }
 0x134   :  { %v2092_v22 = vadd.f32 %v770_v13, %v738_v12  ;;  %v865_v28 = vsel %vm864_vm12, %v2014_v6, %v863_v10  ;;  %v872_v3 = vsel %vm871_vm13, %v2020_v9, %v870_v25  ;;  %vm887_vm1 = vcmp.eq.f32.partialorder %v2045_v38, 0.0 }
 0x135   :  { %1643 = vrsqrt.f32 %v2088_v18  ;;  %v2100_v26 = vadd.f32 %v771_v20, %v739_v19  ;;  %v1634_v29 = vpop.eup %1633  ;;  %v868_v17 = vsel %vm866_vm15, %v867_v21, %v865_v28  ;;  %v380_v62 = vpop.f32.mrb[16].mxu0  ;;  %v875_v31 = vsel %vm873_vm14, %v874_v41, %v872_v3 }
 0x136   :  { %1645 = vrsqrt.f32 %v2092_v22  ;;  %v685_v24 = vpop.f32.mrb[16].mxu1  ;;  %v1046_v33 = vpack.c.bf16 %v868_v17, %v854_v27  ;;  %v740_v35 = vmul.f32 %v380_v62, %v380_v62  ;;  %v382_v6 = vpop.f32.mrb[17].mxu0  ;;  %v1047_v39 = vpack.c.bf16 %v875_v31, %v861_v23 }
 0x137   :  { %v1636_v30 = vpop.eup %1635  ;;  %1647 = vrsqrt.f32 %v2100_v26  ;;  %v772_v36 = vmul.f32 %v685_v24, %v685_v24  ;;  %v687_v37 = vpop.f32.mrb[17].mxu1  ;;  %v741_v45 = vmul.f32 %v382_v6, %v382_v6  ;;  %v888_v52 = vand.u32 2147483648, %v2045_v38 }
 0x138   :  { %v1638_v34 = vpop.eup %1637  ;;  %v884_v40 = vmul.f32 %v1636_v30, %v2045_v38  ;;  %v773_v48 = vmul.f32 %v687_v37, %v687_v37  ;;  %v384_v49 = vpop.f32.mrb[18].mxu0  ;;  %vm899_vm2 = vcmp.eq.f32.partialorder %v2058_v46, inf  ;;  %1228 = vmatprep.mubr.bf16.mxu0 %v1047_v39  ;;  %vm901_vm3 = vcmp.eq.f32.partialorder %v2058_v46, 0.0 }
 0x139   :  { %v1640_v44 = vpop.eup %1639  ;;  %v689_v47 = vpop.f32.mrb[18].mxu1  ;;  %v2125_v9 = vadd.f32 %v772_v36, %v740_v35  ;;  %v742_v41 = vmul.f32 %v384_v49, %v384_v49  ;;  %v902_v63 = vand.u32 2147483648, %v2058_v46  ;;  %v877_v0 = vmul.f32 %v1634_v29, %v2040_v32 }
 0x13a   :  { %v774_v53 = vmul.f32 %v689_v47, %v689_v47  ;;  %v386_v42 = vpop.f32.mrb[19].mxu0  ;;  %v691_v54 = vpop.f32.mrb[19].mxu1  ;;  %v886_v55 = vsel %vm885_vm0, %v2045_v38, %v884_v40  ;;  %v2130_v56 = vadd.f32 %v773_v48, %v741_v45  ;;  %1229 = vmatmul.mubr.bf16.gmra.mrb[36].mxu0 %v1046_v33  ;;  %v898_v61 = vmul.f32 %v1640_v44, %v2058_v46 }
 0x13b   :  { %v743_v57 = vmul.f32 %v386_v42, %v386_v42  ;;  %v775_v58 = vmul.f32 %v691_v54, %v691_v54  ;;  %1649 = vrsqrt.f32 %v2125_v9  ;;  %v889_v60 = vsel %vm887_vm1, %v888_v52, %v886_v55 }
 0x13c   :  { %v2134_v59 = vadd.f32 %v774_v53, %v742_v41  ;;  %1651 = vrsqrt.f32 %v2130_v56  ;;  %v900_v2 = vsel %vm899_vm2, %v2058_v46, %v898_v61  ;;  %vm878_vm4 = vcmp.eq.f32.partialorder %v2040_v32, inf }
 0x13d   :  { %v2140_v50 = vadd.f32 %v775_v58, %v743_v57  ;;  %v2144_v1 = vpop.eup %1641  ;;  %vm880_vm5 = vcmp.eq.f32.partialorder %v2040_v32, 0.0  ;;  %v390_v4 = vpop.f32.mrb[20].mxu0  ;;  %v903_v7 = vsel %vm901_vm3, %v902_v63, %v900_v2  ;;  %v879_v8 = vsel %vm878_vm4, %v2040_v32, %v877_v0 }
 0x13e   :  { %1653 = vrsqrt.f32 %v2134_v59  ;;  %v695_v5 = vpop.f32.mrb[20].mxu1  ;;  %v881_v51 = vand.u32 2147483648, %v2040_v32  ;;  %v891_v10 = vmul.f32 %v1638_v34, %v2050_v43  ;;  %v744_v13 = vmul.f32 %v390_v4, %v390_v4  ;;  %v392_v15 = vpop.f32.mrb[21].mxu0 }
 0x13f   :  { %v1644_v38 = vpop.eup %1643  ;;  %1655 = vrsqrt.f32 %v2140_v50  ;;  %v776_v14 = vmul.f32 %v695_v5, %v695_v5  ;;  %v697_v16 = vpop.f32.mrb[21].mxu1  ;;  %v1049_v19 = vpack.c.bf16 %v903_v7, %v889_v60  ;;  %v745_v21 = vmul.f32 %v392_v15, %v392_v15 }
 0x140   :  { %v2157_v12 = vpop.eup %1645  ;;  %v777_v23 = vmul.f32 %v697_v16, %v697_v16  ;;  %v394_v46 = vpop.f32.mrb[22].mxu0  ;;  %v882_v27 = vsel %vm880_vm5, %v881_v51, %v879_v8  ;;  %vm892_vm6 = vcmp.eq.f32.partialorder %v2050_v43, inf  ;;  %v895_v31 = vand.u32 2147483648, %v2050_v43 }
 0x141   :  { %v1648_v20 = vpop.eup %1647  ;;  %v699_v25 = vpop.f32.mrb[22].mxu1  ;;  %v2163_v28 = vadd.f32 %v776_v14, %v744_v13  ;;  %1236 = vmatprep.mubr.bf16.mxu0 %v1049_v19  ;;  %v746_v29 = vmul.f32 %v394_v46, %v394_v46  ;;  %v893_v17 = vsel %vm892_vm6, %v2050_v43, %v891_v10  ;;  %vm894_vm7 = vcmp.eq.f32.partialorder %v2050_v43, 0.0 }
 0x142   :  { %v778_v3 = vmul.f32 %v699_v25, %v699_v25  ;;  %v396_v30 = vpop.f32.mrb[23].mxu0  ;;  %v701_v62 = vpop.f32.mrb[23].mxu1  ;;  %v2166_v24 = vadd.f32 %v777_v23, %v745_v21  ;;  %v912_v35 = vmul.f32 %v1644_v38, %v2088_v18  ;;  %v896_v36 = vsel %vm894_vm7, %v895_v31, %v893_v17 }
 0x143   :  { %v747_v33 = vmul.f32 %v396_v30, %v396_v30  ;;  %v779_v34 = vmul.f32 %v701_v62, %v701_v62  ;;  %1657 = vrsqrt.f32 %v2163_v28  ;;  %vm913_vm8 = vcmp.eq.f32.partialorder %v2088_v18, inf }
 0x144   :  { %v2170_v32 = vadd.f32 %v778_v3, %v746_v29  ;;  %1659 = vrsqrt.f32 %v2166_v24  ;;  %v1048_v39 = vpack.c.bf16 %v896_v36, %v882_v27  ;;  %v914_v40 = vsel %vm913_vm8, %v2088_v18, %v912_v35 }
 0x145   :  { %v2175_v6 = vadd.f32 %v779_v34, %v747_v33  ;;  %v2178_v37 = vpop.eup %1649  ;;  %vm915_vm9 = vcmp.eq.f32.partialorder %v2088_v18, 0.0  ;;  %v916_v44 = vand.u32 2147483648, %v2088_v18  ;;  %v400_v43 = vpop.f32.mrb[24].mxu0  ;;  %v926_v49 = vmul.f32 %v1648_v20, %v2100_v26 }
 0x146   :  { %v1652_v45 = vpop.eup %1651  ;;  %1661 = vrsqrt.f32 %v2170_v32  ;;  %v705_v48 = vpop.f32.mrb[24].mxu1  ;;  %vm927_vm10 = vcmp.eq.f32.partialorder %v2100_v26, inf  ;;  %vm929_vm11 = vcmp.eq.f32.partialorder %v2100_v26, 0.0  ;;  %1237 = vmatmul.mubr.bf16.gmra.mrb[40].mxu0 %v1048_v39  ;;  %v748_v52 = vmul.f32 %v400_v43, %v400_v43 }
 0x147   :  { %v780_v41 = vmul.f32 %v705_v48, %v705_v48  ;;  %v402_v53 = vpop.f32.mrb[25].mxu0  ;;  %v707_v42 = vpop.f32.mrb[25].mxu1  ;;  %v917_v54 = vsel %vm915_vm9, %v916_v44, %v914_v40  ;;  %v930_v18 = vand.u32 2147483648, %v2100_v26  ;;  %v928_v58 = vsel %vm927_vm10, %v2100_v26, %v926_v49 }
 0x148   :  { %v2187_v47 = vpop.eup %1653  ;;  %v749_v55 = vmul.f32 %v402_v53, %v402_v53  ;;  %v781_v57 = vmul.f32 %v707_v42, %v707_v42  ;;  %v404_v60 = vpop.f32.mrb[26].mxu0  ;;  %v905_v63 = vmul.f32 %v2144_v1, %v2083_v11  ;;  %1663 = vrsqrt.f32 %v2175_v6 }
 0x149   :  { %v709_v61 = vpop.f32.mrb[26].mxu1  ;;  %v1656_v0 = vpop.eup %1655  ;;  %v2193_v2 = vadd.f32 %v780_v41, %v748_v52  ;;  %v931_v38 = vsel %vm929_vm11, %v930_v18, %v928_v58  ;;  %v750_v4 = vmul.f32 %v404_v60, %v404_v60  ;;  %vm906_vm12 = vcmp.eq.f32.partialorder %v2083_v11, inf }
 0x14a   :  { %v782_v5 = vmul.f32 %v709_v61, %v709_v61  ;;  %v406_v7 = vpop.f32.mrb[27].mxu0  ;;  %v711_v8 = vpop.f32.mrb[27].mxu1  ;;  %v2198_v51 = vadd.f32 %v781_v57, %v749_v55  ;;  %v1051_v10 = vpack.c.bf16 %v931_v38, %v917_v54  ;;  %vm908_vm13 = vcmp.eq.f32.partialorder %v2083_v11, 0.0 }
 0x14b   :  { %1665 = vrsqrt.f32 %v2193_v2  ;;  %v907_v26 = vsel %vm906_vm12, %v2083_v11, %v905_v63  ;;  %v909_v1 = vand.u32 2147483648, %v2083_v11  ;;  %v919_v14 = vmul.f32 %v2157_v12, %v2092_v22 }
 0x14c   :  { %v2201_v13 = vadd.f32 %v782_v5, %v750_v4  ;;  %1667 = vrsqrt.f32 %v2198_v51  ;;  %1244 = vmatprep.mubr.bf16.mxu0 %v1051_v10  ;;  %vm920_vm14 = vcmp.eq.f32.partialorder %v2092_v22, inf  ;;  %vm922_vm15 = vcmp.eq.f32.partialorder %v2092_v22, 0.0 }
 0x14d   :  { %v2210_v15 = vpop.eup %1657  ;;  %v923_v16 = vand.u32 2147483648, %v2092_v22  ;;  %v751_v19 = vmul.f32 %v406_v7, %v406_v7  ;;  %v921_v21 = vsel %vm920_vm14, %v2092_v22, %v919_v14  ;;  %v783_v23 = vmul.f32 %v711_v8, %v711_v8  ;;  %v410_v46 = vpop.f32.mrb[28].mxu0 }
 0x14e   :  { %v2215_v20 = vpop.eup %1659  ;;  %1669 = vrsqrt.f32 %v2201_v13  ;;  %v715_v25 = vpop.f32.mrb[28].mxu1  ;;  %v940_v12 = vmul.f32 %v1652_v45, %v2130_v56  ;;  %v910_v27 = vsel %vm908_vm13, %v909_v1, %v907_v26  ;;  %v752_v3 = vmul.f32 %v410_v46, %v410_v46 }
 0x14f   :  { %v924_v29 = vsel %vm922_vm15, %v923_v16, %v921_v21  ;;  %v784_v17 = vmul.f32 %v715_v25, %v715_v25  ;;  %v412_v30 = vpop.f32.mrb[29].mxu0  ;;  %v717_v62 = vpop.f32.mrb[29].mxu1  ;;  %v2224_v34 = vadd.f32 %v783_v23, %v751_v19  ;;  %vm941_vm0 = vcmp.eq.f32.partialorder %v2130_v56, inf }
 0x150   :  { %v2222_v31 = vpop.eup %1661  ;;  %v1050_v33 = vpack.c.bf16 %v924_v29, %v910_v27  ;;  %v753_v35 = vmul.f32 %v412_v30, %v412_v30  ;;  %v785_v22 = vmul.f32 %v717_v62, %v717_v62  ;;  %v414_v36 = vpop.f32.mrb[30].mxu0  ;;  %vm943_vm1 = vcmp.eq.f32.partialorder %v2130_v56, 0.0 }
 0x151   :  { %v719_v39 = vpop.f32.mrb[30].mxu1  ;;  %v2226_v40 = vadd.f32 %v784_v17, %v752_v3  ;;  %v954_v11 = vmul.f32 %v1656_v0, %v2140_v50  ;;  %v416_v44 = vpop.f32.mrb[31].mxu0  ;;  %v942_v48 = vsel %vm941_vm0, %v2130_v56, %v940_v12  ;;  %v944_v49 = vand.u32 2147483648, %v2130_v56 }
 0x152   :  { %v721_v45 = vpop.f32.mrb[31].mxu1  ;;  %1245 = vmatmul.mubr.bf16.gmra.mrb[44].mxu0 %v1050_v33  ;;  %v2231_v43 = vadd.f32 %v785_v22, %v753_v35  ;;  %vm955_vm2 = vcmp.eq.f32.partialorder %v2140_v50, inf  ;;  %1671 = vrsqrt.f32 %v2224_v34  ;;  %vm957_vm3 = vcmp.eq.f32.partialorder %v2140_v50, 0.0  ;;  %v1664_v53 = vpop.eup %1663 }
 0x153   :  { %v956_v52 = vsel %vm955_vm2, %v2140_v50, %v954_v11  ;;  %v958_v41 = vand.u32 2147483648, %v2140_v50  ;;  %1673 = vrsqrt.f32 %v2226_v40  ;;  %v754_v42 = vmul.f32 %v414_v36, %v414_v36 }
 0x154   :  { %v786_v54 = vmul.f32 %v719_v39, %v719_v39  ;;  %v933_v18 = vmul.f32 %v2178_v37, %v2125_v9  ;;  %1675 = vrsqrt.f32 %v2231_v43  ;;  %v945_v57 = vsel %vm943_vm1, %v944_v49, %v942_v48 }
 0x155   :  { %v2243_v55 = vpop.eup %1665  ;;  %v959_v58 = vsel %vm957_vm3, %v958_v41, %v956_v52  ;;  %vm934_vm4 = vcmp.eq.f32.partialorder %v2125_v9, inf  ;;  %v947_v0 = vmul.f32 %v2187_v47, %v2134_v59  ;;  %vm936_vm5 = vcmp.eq.f32.partialorder %v2125_v9, 0.0 }
 0x156   :  { %v1668_v60 = vpop.eup %1667  ;;  %v1053_v50 = vpack.c.bf16 %v959_v58, %v945_v57  ;;  %v2249_v61 = vadd.f32 %v786_v54, %v754_v42  ;;  %v935_v63 = vsel %vm934_vm4, %v2125_v9, %v933_v18  ;;  %v937_v37 = vand.u32 2147483648, %v2125_v9 }
 0x157   :  { %vm948_vm6 = vcmp.eq.f32.partialorder %v2134_v59, inf  ;;  %v951_v56 = vand.u32 2147483648, %v2134_v59  ;;  %vm950_vm7 = vcmp.eq.f32.partialorder %v2134_v59, 0.0  ;;  %v755_v5 = vmul.f32 %v416_v44, %v416_v44 }
 0x158   :  { %v1670_v38 = vpop.eup %1669  ;;  %1252 = vmatprep.mubr.bf16.mxu1 %v1053_v50  ;;  %v949_v4 = vsel %vm948_vm6, %v2134_v59, %v947_v0  ;;  %v787_v7 = vmul.f32 %v721_v45, %v721_v45  ;;  %v938_v8 = vsel %vm936_vm5, %v937_v37, %v935_v63  ;;  %v968_v47 = vmul.f32 %v2215_v20, %v2166_v24 }
 0x159   :  { %v952_v10 = vsel %vm950_vm7, %v951_v56, %v949_v4  ;;  %vm969_vm8 = vcmp.eq.f32.partialorder %v2166_v24, inf  ;;  %vm971_vm9 = vcmp.eq.f32.partialorder %v2166_v24, 0.0  ;;  %v982_v1 = vmul.f32 %v1664_v53, %v2175_v6 }
 0x15a   :  { %v1052_v9 = vpack.c.bf16 %v952_v10, %v938_v8  ;;  %v2263_v26 = vadd.f32 %v787_v7, %v755_v5  ;;  %v970_v14 = vsel %vm969_vm8, %v2166_v24, %v968_v47  ;;  %v972_v59 = vand.u32 2147483648, %v2166_v24 }
 0x15b   :  { %vm983_vm10 = vcmp.eq.f32.partialorder %v2175_v6, inf  ;;  %v986_v16 = vand.u32 2147483648, %v2175_v6  ;;  %vm985_vm11 = vcmp.eq.f32.partialorder %v2175_v6, 0.0  ;;  %v961_v20 = vmul.f32 %v2210_v15, %v2163_v28 }
 0x15c   :  { %1253 = vmatmul.mubr.bf16.vlgmr.msra.gmra.mrb[32].mxu1 %v1052_v9  ;;  %1677 = vrsqrt.f32 %v2263_v26  ;;  %v984_v19 = vsel %vm983_vm10, %v2175_v6, %v982_v1  ;;  %v1672_v21 = vpop.eup %1671  ;;  %v973_v23 = vsel %vm971_vm9, %v972_v59, %v970_v14  ;;  %vm962_vm12 = vcmp.eq.f32.partialorder %v2163_v28, inf }
 0x15d   :  { %1679 = vrsqrt.f32 %v2249_v61  ;;  %v987_v46 = vsel %vm985_vm11, %v986_v16, %v984_v19  ;;  %v1674_v24 = vpop.eup %1673  ;;  %v963_v12 = vsel %vm962_vm12, %v2163_v28, %v961_v20  ;;  %v965_v27 = vand.u32 2147483648, %v2163_v28 }
 0x15e   :  { %v1055_v25 = vpack.c.bf16 %v987_v46, %v973_v23  ;;  %v975_v29 = vmul.f32 %v2222_v31, %v2170_v32  ;;  %v1676_v6 = vpop.eup %1675  ;;  %vm964_vm13 = vcmp.eq.f32.partialorder %v2163_v28, 0.0  ;;  %vm976_vm14 = vcmp.eq.f32.partialorder %v2170_v32, inf }
 0x15f   :  { %v979_v15 = vand.u32 2147483648, %v2170_v32  ;;  %v996_v3 = vmul.f32 %v1668_v60, %v2198_v51  ;;  %v966_v17 = vsel %vm964_vm13, %v965_v27, %v963_v12  ;;  %vm978_vm15 = vcmp.eq.f32.partialorder %v2170_v32, 0.0 }
 0x160   :  { %1260 = vmatprep.mubr.bf16.mxu1 %v1055_v25  ;;  %v977_v30 = vsel %vm976_vm14, %v2170_v32, %v975_v29  ;;  %vm997_vm0 = vcmp.eq.f32.partialorder %v2198_v51, inf  ;;  %v1000_v33 = vand.u32 2147483648, %v2198_v51  ;;  %v1010_v28 = vmul.f32 %v1672_v21, %v2224_v34 }
 0x161   :  { %v980_v62 = vsel %vm978_vm15, %v979_v15, %v977_v30  ;;  %v998_v31 = vsel %vm997_vm0, %v2198_v51, %v996_v3  ;;  %vm999_vm1 = vcmp.eq.f32.partialorder %v2198_v51, 0.0  ;;  %vm1011_vm2 = vcmp.eq.f32.partialorder %v2224_v34, inf }
 0x162   :  { %v1054_v35 = vpack.c.bf16 %v980_v62, %v966_v17  ;;  %v1014_v22 = vand.u32 2147483648, %v2224_v34  ;;  %v1001_v36 = vsel %vm999_vm1, %v1000_v33, %v998_v31  ;;  %v1012_v39 = vsel %vm1011_vm2, %v2224_v34, %v1010_v28 }
 0x163   :  { %vm1013_vm3 = vcmp.eq.f32.partialorder %v2224_v34, 0.0  ;;  %v989_v32 = vmul.f32 %v2243_v55, %v2193_v2  ;;  %vm990_vm4 = vcmp.eq.f32.partialorder %v2193_v2, inf  ;;  %v993_v44 = vand.u32 2147483648, %v2193_v2 }
 0x164   :  { %1261 = vmatmul.mubr.bf16.gmra.mrb[36].mxu1 %v1054_v35  ;;  %v1015_v11 = vsel %vm1013_vm3, %v1014_v22, %v1012_v39  ;;  %v1003_v51 = vmul.f32 %v1670_v38, %v2201_v13  ;;  %vm1004_vm5 = vcmp.eq.f32.partialorder %v2201_v13, inf  ;;  %v1007_v49 = vand.u32 2147483648, %v2201_v13 }
 0x165   :  { %v1057_v45 = vpack.c.bf16 %v1015_v11, %v1001_v36  ;;  %v991_v48 = vsel %vm990_vm4, %v2193_v2, %v989_v32  ;;  %vm992_vm6 = vcmp.eq.f32.partialorder %v2193_v2, 0.0  ;;  %vm1006_vm7 = vcmp.eq.f32.partialorder %v2201_v13, 0.0 }
 0x166   :  { %v1678_v52 = vpop.eup %1677  ;;  %v1005_v34 = vsel %vm1004_vm5, %v2201_v13, %v1003_v51  ;;  %v1024_v41 = vmul.f32 %v1676_v6, %v2231_v43  ;;  %v994_v42 = vsel %vm992_vm6, %v993_v44, %v991_v48  ;;  %vm1025_vm8 = vcmp.eq.f32.partialorder %v2231_v43, inf }
 0x167   :  { %v1680_v53 = vpop.eup %1679  ;;  %1268 = vmatprep.mubr.bf16.mxu1 %v1057_v45  ;;  %v1008_v54 = vsel %vm1006_vm7, %v1007_v49, %v1005_v34  ;;  %v1038_v18 = vmul.f32 %v1678_v52, %v2263_v26  ;;  %vm1039_vm9 = vcmp.eq.f32.partialorder %v2263_v26, inf  ;;  %v1028_v2 = vand.u32 2147483648, %v2231_v43 }
 0x168   :  { %v1056_v55 = vpack.c.bf16 %v1008_v54, %v994_v42  ;;  %v1026_v57 = vsel %vm1025_vm8, %v2231_v43, %v1024_v41  ;;  %v1042_v13 = vand.u32 2147483648, %v2263_v26  ;;  %v1017_v60 = vmul.f32 %v1674_v24, %v2226_v40 }
 0x169   :  { %v1040_v58 = vsel %vm1039_vm9, %v2263_v26, %v1038_v18  ;;  %vm1027_vm10 = vcmp.eq.f32.partialorder %v2231_v43, 0.0  ;;  %vm1041_vm11 = vcmp.eq.f32.partialorder %v2263_v26, 0.0  ;;  %vm1018_vm12 = vcmp.eq.f32.partialorder %v2226_v40, inf }
 0x16a   :  { %v1031_v50 = vmul.f32 %v1680_v53, %v2249_v61  ;;  %v1029_v63 = vsel %vm1027_vm10, %v1028_v2, %v1026_v57  ;;  %v1043_v0 = vsel %vm1041_vm11, %v1042_v13, %v1040_v58  ;;  %v1019_v37 = vsel %vm1018_vm12, %v2226_v40, %v1017_v60 }
 0x16b   :  { %vm1032_vm13 = vcmp.eq.f32.partialorder %v2249_v61, inf  ;;  %v1059_v56 = vpack.c.bf16 %v1043_v0, %v1029_v63  ;;  %v1021_v38 = vand.u32 2147483648, %v2226_v40  ;;  %v1035_v43 = vand.u32 2147483648, %v2249_v61 }
 0x16c   :  { %1269 = vmatmul.mubr.bf16.gmra.mrb[40].mxu1 %v1056_v55  ;;  %v1033_v4 = vsel %vm1032_vm13, %v2249_v61, %v1031_v50  ;;  %vm1020_vm14 = vcmp.eq.f32.partialorder %v2226_v40, 0.0  ;;  %vm1034_vm15 = vcmp.eq.f32.partialorder %v2249_v61, 0.0 }
 0x16d   :  { %1276 = vmatprep.mubr.bf16.mxu1 %v1059_v56  ;;  %v1022_v5 = vsel %vm1020_vm14, %v1021_v38, %v1019_v37  ;;  %v1036_v7 = vsel %vm1034_vm15, %v1035_v43, %v1033_v4 }
 0x16e   :  { %v1058_v8 = vpack.c.bf16 %v1036_v7, %v1022_v5 }
 0x174   :  { %1277 = vmatmul.mubr.bf16.gmra.mrb[44].mxu1 %v1058_v8 }
 0x205   :  { %v1417_v10 = vpop.f32.mrb[32].mxu0 }
 0x206   :  { %v1418_v47 = vpop.f32.mrb[33].mxu0 }
 0x207   :  { %v1419_v9 = vadd.f32 %v1418_v47, %v1417_v10  ;;  %v1420_v26 = vpop.f32.mrb[34].mxu0 }
 0x208   :  { %v1421_v1 = vpop.f32.mrb[35].mxu0 }
 0x209   :  { %1285 = vst [vmem:[%s2380_s4] sm:$0xff] %v1419_v9  ;;  %v1422_v14 = vadd.f32 %v1421_v1, %v1420_v26 }
 0x20b   :  { %1286 = vst [vmem:[%s2380_s4 + $0x8] sm:$0xff] %v1422_v14 }
 0x20d   :  { %v1423_v40 = vpop.f32.mrb[36].mxu0 }
 0x20e   :  { %v1424_v61 = vpop.f32.mrb[37].mxu0 }
 0x20f   :  { %v1425_v59 = vadd.f32 %v1424_v61, %v1423_v40  ;;  %v1426_v16 = vpop.f32.mrb[38].mxu0 }
 0x210   :  { %v1427_v19 = vpop.f32.mrb[39].mxu0 }
 0x211   :  { %1287 = vst [vmem:[%s2380_s4 + $0x10] sm:$0xff] %v1425_v59  ;;  %v1428_v20 = vadd.f32 %v1427_v19, %v1426_v16 }
 0x213   :  { %1288 = vst [vmem:[%s2380_s4 + $0x18] sm:$0xff] %v1428_v20 }
 0x219   :  { %v1429_v21 = vpop.f32.mrb[40].mxu0 }
 0x21a   :  { %v1430_v23 = vpop.f32.mrb[41].mxu0 }
 0x21b   :  { %v1431_v46 = vadd.f32 %v1430_v23, %v1429_v21  ;;  %v1432_v24 = vpop.f32.mrb[42].mxu0 }
 0x21c   :  { %v1433_v25 = vpop.f32.mrb[43].mxu0 }
 0x21d   :  { %1289 = vst [vmem:[%s2380_s4 + $0x20] sm:$0xff] %v1431_v46  ;;  %v1434_v12 = vadd.f32 %v1433_v25, %v1432_v24 }
 0x21f   :  { %1290 = vst [vmem:[%s2380_s4 + $0x28] sm:$0xff] %v1434_v12 }
 0x225   :  { %v1435_v27 = vpop.f32.mrb[44].mxu0 }
 0x226   :  { %v1436_v29 = vpop.f32.mrb[45].mxu0 }
 0x227   :  { %v1437_v6 = vadd.f32 %v1436_v29, %v1435_v27  ;;  %v1438_v15 = vpop.f32.mrb[46].mxu0 }
 0x228   :  { %v1439_v3 = vpop.f32.mrb[47].mxu0 }
 0x229   :  { %1291 = vst [vmem:[%s2380_s4 + $0x30] sm:$0xff] %v1437_v6  ;;  %v1440_v17 = vadd.f32 %v1439_v3, %v1438_v15 }
 0x22b   :  { %1292 = vst [vmem:[%s2380_s4 + $0x38] sm:$0xff] %v1440_v17 }
 0x22f   :  { %v1441_v30 = vpop.f32.mrb[32].mxu1 }
 0x230   :  { %v1442_v62 = vpop.f32.mrb[33].mxu1 }
 0x231   :  { %v1443_v31 = vadd.f32 %v1442_v62, %v1441_v30  ;;  %v1444_v33 = vpop.f32.mrb[34].mxu1 }
 0x232   :  { %v1445_v28 = vpop.f32.mrb[35].mxu1 }
 0x233   :  { %1293 = vst [vmem:[%s2380_s4 + $0x40] sm:$0xff] %v1443_v31  ;;  %v1446_v35 = vadd.f32 %v1445_v28, %v1444_v33 }
 0x235   :  { %1294 = vst [vmem:[%s2380_s4 + $0x48] sm:$0xff] %v1446_v35 }
 0x237   :  { %v1447_v22 = vpop.f32.mrb[36].mxu1 }
 0x238   :  { %v1448_v36 = vpop.f32.mrb[37].mxu1 }
 0x239   :  { %v1449_v39 = vadd.f32 %v1448_v36, %v1447_v22  ;;  %v1450_v32 = vpop.f32.mrb[38].mxu1 }
 0x23a   :  { %v1451_v11 = vpop.f32.mrb[39].mxu1 }
 0x23b   :  { %1295 = vst [vmem:[%s2380_s4 + $0x50] sm:$0xff] %v1449_v39  ;;  %v1452_v44 = vadd.f32 %v1451_v11, %v1450_v32 }
 0x23d   :  { %1296 = vst [vmem:[%s2380_s4 + $0x58] sm:$0xff] %v1452_v44 }
 0x23f   :  { %v1453_v51 = vpop.f32.mrb[40].mxu1 }
 0x240   :  { %v1454_v45 = vpop.f32.mrb[41].mxu1 }
 0x241   :  { %v1455_v48 = vadd.f32 %v1454_v45, %v1453_v51  ;;  %v1456_v49 = vpop.f32.mrb[42].mxu1 }
 0x242   :  { %v1457_v52 = vpop.f32.mrb[43].mxu1 }
 0x243   :  { %1297 = vst [vmem:[%s2380_s4 + $0x60] sm:$0xff] %v1455_v48  ;;  %v1458_v34 = vadd.f32 %v1457_v52, %v1456_v49 }
 0x245   :  { %1298 = vst [vmem:[%s2380_s4 + $0x68] sm:$0xff] %v1458_v34 }
 0x247   :  { %v1459_v41 = vpop.f32.mrb[44].mxu1 }
 0x248   :  { %v1460_v53 = vpop.f32.mrb[45].mxu1 }
 0x249   :  { %v1461_v42 = vadd.f32 %v1460_v53, %v1459_v41  ;;  %v1462_v54 = vpop.f32.mrb[46].mxu1 }
 0x24a   :  { %v1463_v18 = vpop.f32.mrb[47].mxu1 }
 0x24b   :  { %1299 = vst [vmem:[%s2380_s4 + $0x70] sm:$0xff] %v1461_v42  ;;  %v1464_v55 = vadd.f32 %v1463_v18, %v1462_v54 }
 0x24d   :  { %1300 = vst [vmem:[%s2380_s4 + $0x78] sm:$0xff] %v1464_v55 }

// kernel: multiscale_stft_forward.3
= control target key start
LH: loop header
LB: loop body
LE: loop exit
PB: predicated region body
PF: predicated region fallthrough
CT: control target
= control target key end

     0   :  { %s1226_s15 = smov 0   ;;  %s1505_s0 = inlined_call_operand.vmem [shape: bf16[256,64], index: 0, kind: input, shape index: {}]   ;;  %s1506_s1 = inlined_call_operand.vmem [shape: bf16[64,128], index: 1, kind: input, shape index: {}]   ;;  %s1507_s2 = inlined_call_operand.vmem [shape: bf16[64,128], index: 2, kind: input, shape index: {}]   ;;  %s1508_s3 = inlined_call_operand.vmem [shape: bf16[128,128], index: 3, kind: input, shape index: {}]   ;;  %s1509_s4 = inlined_call_operand.vmem [shape: f32[256,128], index: 4, kind: output, shape index: {}]  }
   0x1 LB: > { %s942_s16 = sadd.s32 4294967295, %s1199_s15   ;;  %p946_p0 = scmp.ge.s32.totalorder %s1199_s15, 1  ;;  %s1199_s15 = sphi %s1226_s15, %s14_s15  }
   0x2   : > { %p163_p1 = scmp.lt.s32.totalorder %s1199_s15, 3 }
   0x4   : > { %p164_p2 = pnand %p946_p0, %p163_p1 }
   0x5   : > { %v1137_v0 = vld [vmem:[%s1506_s1] sm:$0xff] (!%p164_p2)   ;;  %s947_s19 = sshll.u32 (!%p164_p2), %s942_s16, 4  ;;  %v1139_v2 = vld [vmem:[%s1506_s1 + $0x8] sm:$0xff] (!%p164_p2)   ;;  %v1141_v4 = vld [vmem:[%s1506_s1 + $0x10] sm:$0xff] (!%p164_p2)   ;;  %vm290_vm0 = vcmask (!%p164_p2), 523264  }
   0x6   : > { %167 = sbr.rel (%p164_p2) target bundleno = 501 (0x1f5), region = 36  ;;  %v1138_v1 = vld [vmem:[%s1507_s2] sm:$0xff] (!%p164_p2)   ;;  %p190_p3 = scmp.lt.s32.totalorder (!%p164_p2), %s947_s19, 31  ;;  %1033 = vmatprep.subr.bf16.mxu0 (!%p164_p2), %v1137_v0  ;;  %v1140_v3 = vld [vmem:[%s1507_s2 + $0x8] sm:$0xff] (!%p164_p2)   ;;  %v1142_v5 = vld [vmem:[%s1507_s2 + $0x10] sm:$0xff] (!%p164_p2)  }
   0x7   : > { %1057 = vmatprep.subr.bf16.mxu1 (!%p164_p2), %v1138_v1  ;;  %1034 = vmatpush3.bf16.msra.mxu0 (!%p164_p2), %v1137_v0  ;;  %v1143_v6 = vld [vmem:[%s1506_s1 + $0x18] sm:$0xff] (!%p164_p2)   ;;  %v1153_v11 = vld [vmem:[%s1508_s3] sm:$0xff] (!%p164_p2)   ;;  %v1154_v12 = vld [vmem:[%s1508_s3 + $0x8] sm:$0xff] (!%p164_p2)  }
   0x8   : > { %1058 = vmatpush3.bf16.msra.mxu1 (!%p164_p2), %v1138_v1  ;;  %1035 = vmatprep.subr.bf16.mxu0 (!%p164_p2), %v1139_v2  ;;  %v1144_v8 = vld [vmem:[%s1507_s2 + $0x18] sm:$0xff] (!%p164_p2)   ;;  %v1155_v18 = vld [vmem:[%s1508_s3 + $0x10] sm:$0xff] (!%p164_p2)   ;;  %v1157_v20 = vld [vmem:[%s1508_s3 + $0x20] sm:$0xff] (!%p164_p2)  }
   0x9   : > { %1059 = vmatprep.subr.bf16.mxu1 (!%p164_p2), %v1140_v3  ;;  %v1156_v19 = vld [vmem:[%s1508_s3 + $0x18] sm:$0xff] (!%p164_p2)   ;;  %v1158_v21 = vld [vmem:[%s1508_s3 + $0x28] sm:$0xff] (!%p164_p2)   ;;  %v1159_v22 = vld [vmem:[%s1508_s3 + $0x30] sm:$0xff] (!%p164_p2)  }
   0xa   : > { %v1160_v23 = vld [vmem:[%s1508_s3 + $0x38] sm:$0xff] (!%p164_p2)  }
   0xb   : > { %1036 = vmatpush3.bf16.msra.mxu0 (!%p164_p2), %v1139_v2 }
   0xc   : > { %1060 = vmatpush3.bf16.msra.mxu1 (!%p164_p2), %v1140_v3  ;;  %1037 = vmatprep.subr.bf16.mxu0 (!%p164_p2), %v1141_v4 }
   0xd   : > { %s1511_s19 = smov (!%p190_p3, %s947_s19), 31  ;;  %1061 = vmatprep.subr.bf16.mxu1 %v1142_v5 }
   0xe   : > { %s948_s30 = sshll.u32 %s1511_s19, 2 }
   0xf   : > { %s1258_s7 = scalar_lea.vmem %s1505_s0, %s948_s30  ;;  %1038 = vmatpush3.bf16.msra.mxu0 %v1141_v4  ;;  %s950_s30 = sshll.u32 %s1511_s19, 3 }
  0x10   : > { %v1145_v7 = vld [vmem:[%s1258_s7] sm:$0xff]   ;;  %1062 = vmatpush3.bf16.msra.mxu1 %v1142_v5  ;;  %1039 = vmatprep.subr.bf16.mxu0 %v1143_v6  ;;  %v1146_v9 = vld [vmem:[%s1258_s7 + $0x8] sm:$0xff]   ;;  %v1147_v10 = vld [vmem:[%s1258_s7 + $0x10] sm:$0xff]  }
  0x11   : > { %1041 = vmatprep.mubr.msk.bf16.mxu0 %vm290_vm0, %v1145_v7  ;;  %1065 = vmatprep.mubr.msk.bf16.mxu1 %vm290_vm0, %v1145_v7  ;;  %v1148_v13 = vld [vmem:[%s1258_s7 + $0x18] sm:$0xff]   ;;  %v1149_v14 = vld [vmem:[%s1258_s7 + $0x20] sm:$0xff]   ;;  %v1150_v15 = vld [vmem:[%s1258_s7 + $0x28] sm:$0xff]  }
  0x12   : > { %1063 = vmatprep.subr.bf16.mxu1 %v1144_v8  ;;  %v1151_v16 = vld [vmem:[%s1258_s7 + $0x30] sm:$0xff]   ;;  %v1152_v17 = vld [vmem:[%s1258_s7 + $0x38] sm:$0xff]   ;;  %s1484_s7 = scalar_lea.vmem %s1509_s4, %s950_s30 }
  0x13   : > { %1040 = vmatpush3.bf16.msra.mxu0 %v1143_v6 }
  0x14   : > { %1064 = vmatpush3.bf16.msra.mxu1 %v1144_v8  ;;  %1081 = vmatprep.subr.bf16.mxu0 %v1153_v11 }
  0x15   : > { %1113 = vmatprep.subr.bf16.mxu1 %v1153_v11 }
  0x16   : > { %1042 = vmatmul.mubr.msk.bf16.vlgmr.msra.gmra.mrb[0].mxu0 %vm290_vm0, %v1146_v9 }
  0x17   : > { %1066 = vmatmul.mubr.msk.bf16.vlgmr.msra.gmra.mrb[0].mxu1 %vm290_vm0, %v1146_v9  ;;  %1045 = vmatprep.mubr.msk.bf16.mxu0 %vm290_vm0, %v1147_v10 }
  0x18   : > { %1069 = vmatprep.mubr.msk.bf16.mxu1 %vm290_vm0, %v1147_v10  ;;  %1082 = vmatpush3.bf16.msra.mxu0 %v1153_v11 }
  0x19   : > { %1083 = vmatprep.subr.bf16.mxu0 %v1154_v12  ;;  %1121 = vmatpush3.bf16.msra.mxu1 %v1153_v11 }
  0x1a   : > { %1114 = vmatprep.subr.bf16.mxu1 %v1154_v12 }
  0x1c   : > { %1084 = vmatpush3.bf16.msra.mxu0 %v1154_v12 }
  0x1d   : > { %1122 = vmatpush3.bf16.msra.mxu1 %v1154_v12  ;;  %1085 = vmatprep.subr.bf16.mxu0 %v1155_v18 }
  0x1e   : > { %1046 = vmatmul.mubr.msk.bf16.gmra.mrb[4].mxu0 %vm290_vm0, %v1148_v13  ;;  %1115 = vmatprep.subr.bf16.mxu1 %v1155_v18 }
  0x1f   : > { %1070 = vmatmul.mubr.msk.bf16.gmra.mrb[4].mxu1 %vm290_vm0, %v1148_v13  ;;  %1049 = vmatprep.mubr.msk.bf16.mxu0 %vm290_vm0, %v1149_v14 }
  0x20   : > { %1073 = vmatprep.mubr.msk.bf16.mxu1 %vm290_vm0, %v1149_v14  ;;  %1086 = vmatpush3.bf16.msra.mxu0 %v1155_v18 }
  0x21   : > { %1123 = vmatpush3.bf16.msra.mxu1 %v1155_v18  ;;  %1087 = vmatprep.subr.bf16.mxu0 %v1156_v19 }
  0x22   : > { %1116 = vmatprep.subr.bf16.mxu1 %v1156_v19 }
  0x24   : > { %1088 = vmatpush3.bf16.msra.mxu0 %v1156_v19 }
  0x25   : > { %1124 = vmatpush3.bf16.msra.mxu1 %v1156_v19  ;;  %1089 = vmatprep.subr.bf16.mxu0 %v1157_v20 }
  0x26   : > { %1050 = vmatmul.mubr.msk.bf16.gmra.mrb[8].mxu0 %vm290_vm0, %v1150_v15  ;;  %1117 = vmatprep.subr.bf16.mxu1 %v1157_v20 }
  0x27   : > { %1074 = vmatmul.mubr.msk.bf16.gmra.mrb[8].mxu1 %vm290_vm0, %v1150_v15  ;;  %1053 = vmatprep.mubr.msk.bf16.mxu0 %vm290_vm0, %v1151_v16 }
  0x28   : > { %1077 = vmatprep.mubr.msk.bf16.mxu1 %vm290_vm0, %v1151_v16  ;;  %1090 = vmatpush3.bf16.msra.mxu0 %v1157_v20 }
  0x29   : > { %1125 = vmatpush3.bf16.msra.mxu1 %v1157_v20  ;;  %1091 = vmatprep.subr.bf16.mxu0 %v1158_v21 }
  0x2a   : > { %1118 = vmatprep.subr.bf16.mxu1 %v1158_v21 }
  0x2c   : > { %1092 = vmatpush3.bf16.msra.mxu0 %v1158_v21 }
  0x2d   : > { %1126 = vmatpush3.bf16.msra.mxu1 %v1158_v21  ;;  %1093 = vmatprep.subr.bf16.mxu0 %v1159_v22 }
  0x2e   : > { %1054 = vmatmul.mubr.msk.bf16.gmra.mrb[12].mxu0 %vm290_vm0, %v1152_v17  ;;  %1119 = vmatprep.subr.bf16.mxu1 %v1159_v22 }
  0x2f   : > { %1078 = vmatmul.mubr.msk.bf16.gmra.mrb[12].mxu1 %vm290_vm0, %v1152_v17 }
  0x30   : > { %1094 = vmatpush3.bf16.msra.mxu0 %v1159_v22 }
  0x31   : > { %1127 = vmatpush3.bf16.msra.mxu1 %v1159_v22  ;;  %1095 = vmatprep.subr.bf16.mxu0 %v1160_v23 }
  0x32   : > { %1120 = vmatprep.subr.bf16.mxu1 %v1160_v23 }
  0x34   : > { %1096 = vmatpush3.bf16.msra.mxu0 %v1160_v23 }
  0x35   : > { %1128 = vmatpush3.bf16.msra.mxu1 %v1160_v23 }
  0xe9   : > { %v1043_v24 = vpop.f32.mrb[0].mxu0 }
  0xea   : > { %v543_v25 = vmul.f32 %v1043_v24, %v1043_v24  ;;  %v1067_v26 = vpop.f32.mrb[0].mxu1  ;;  %v349_v27 = vpop.f32.mrb[1].mxu0 }
  0xeb   : > { %v559_v28 = vmul.f32 %v1067_v26, %v1067_v26  ;;  %v541_v29 = vmul.f32 %v349_v27, %v349_v27  ;;  %v478_v30 = vpop.f32.mrb[1].mxu1  ;;  %v1044_v31 = vpop.f32.mrb[2].mxu0 }
  0xec   : > { %v557_v32 = vmul.f32 %v478_v30, %v478_v30  ;;  %v544_v33 = vmul.f32 %v1044_v31, %v1044_v31  ;;  %v1068_v34 = vpop.f32.mrb[2].mxu1  ;;  %v352_v35 = vpop.f32.mrb[3].mxu0 }
  0xed   : > { %v1314_v36 = vadd.f32 %v559_v28, %v543_v25  ;;  %v560_v37 = vmul.f32 %v1068_v34, %v1068_v34  ;;  %v542_v38 = vmul.f32 %v352_v35, %v352_v35  ;;  %v481_v39 = vpop.f32.mrb[3].mxu1 }
  0xee   : > { %v1316_v40 = vadd.f32 %v557_v32, %v541_v29  ;;  %v558_v41 = vmul.f32 %v481_v39, %v481_v39 }
  0xef   : > { %1161 = vrsqrt.f32 %v1314_v36  ;;  %v1319_v42 = vadd.f32 %v560_v37, %v544_v33  ;;  %vm605_vm1 = vcmp.eq.f32.partialorder %v1314_v36, inf  ;;  %vm607_vm3 = vcmp.eq.f32.partialorder %v1314_v36, 0.0 }
  0xf0   : > { %1163 = vrsqrt.f32 %v1316_v40  ;;  %v1322_v43 = vadd.f32 %v558_v41, %v542_v38  ;;  %vm591_vm2 = vcmp.eq.f32.partialorder %v1316_v40, inf  ;;  %v594_v63 = vand.u32 2147483648, %v1316_v40 }
  0xf1   : > { %1165 = vrsqrt.f32 %v1319_v42  ;;  %v1047_v44 = vpop.f32.mrb[4].mxu0  ;;  %v608_v0 = vand.u32 2147483648, %v1314_v36  ;;  %vm593_vm4 = vcmp.eq.f32.partialorder %v1316_v40, 0.0  ;;  %vm612_vm6 = vcmp.eq.f32.partialorder %v1319_v42, inf }
  0xf2   : > { %1167 = vrsqrt.f32 %v1322_v43  ;;  %v547_v45 = vmul.f32 %v1047_v44, %v1047_v44  ;;  %v1071_v46 = vpop.f32.mrb[4].mxu1  ;;  %v365_v47 = vpop.f32.mrb[5].mxu0  ;;  %vm598_vm5 = vcmp.eq.f32.partialorder %v1322_v43, inf  ;;  %vm600_vm7 = vcmp.eq.f32.partialorder %v1322_v43, 0.0 }
  0xf3   : > { %v563_v48 = vmul.f32 %v1071_v46, %v1071_v46  ;;  %v545_v49 = vmul.f32 %v365_v47, %v365_v47  ;;  %v494_v50 = vpop.f32.mrb[5].mxu1  ;;  %v1048_v51 = vpop.f32.mrb[6].mxu0  ;;  %v601_v4 = vand.u32 2147483648, %v1322_v43  ;;  %vm614_vm8 = vcmp.eq.f32.partialorder %v1319_v42, 0.0 }
  0xf4   : > { %v561_v52 = vmul.f32 %v494_v50, %v494_v50  ;;  %v548_v53 = vmul.f32 %v1048_v51, %v1048_v51  ;;  %v1072_v54 = vpop.f32.mrb[6].mxu1  ;;  %v368_v55 = vpop.f32.mrb[7].mxu0  ;;  %v615_v10 = vand.u32 2147483648, %v1319_v42 }
  0xf5   : > { %v1326_v56 = vadd.f32 %v563_v48, %v547_v45  ;;  %v564_v57 = vmul.f32 %v1072_v54, %v1072_v54  ;;  %v546_v58 = vmul.f32 %v368_v55, %v368_v55  ;;  %v497_v59 = vpop.f32.mrb[7].mxu1 }
  0xf6   : > { %v1329_v60 = vadd.f32 %v561_v52, %v545_v49  ;;  %v562_v61 = vmul.f32 %v497_v59, %v497_v59 }
  0xf7   : > { %1169 = vrsqrt.f32 %v1326_v56  ;;  %v1334_v62 = vadd.f32 %v564_v57, %v548_v53  ;;  %v636_v29 = vand.u32 2147483648, %v1326_v56  ;;  %vm633_vm10 = vcmp.eq.f32.partialorder %v1326_v56, inf }
  0xf8   : > { %1171 = vrsqrt.f32 %v1329_v60  ;;  %v1339_v1 = vadd.f32 %v562_v61, %v546_v58  ;;  %v622_v17 = vand.u32 2147483648, %v1329_v60  ;;  %vm619_vm9 = vcmp.eq.f32.partialorder %v1329_v60, inf }
  0xf9   : > { %v1162_v2 = vpop.eup %1161  ;;  %1173 = vrsqrt.f32 %v1334_v62  ;;  %v1051_v3 = vpop.f32.mrb[8].mxu0  ;;  %vm640_vm11 = vcmp.eq.f32.partialorder %v1334_v62, inf  ;;  %vm621_vm12 = vcmp.eq.f32.partialorder %v1329_v60, 0.0  ;;  %vm635_vm13 = vcmp.eq.f32.partialorder %v1326_v56, 0.0 }
  0xfa   : > { %v1164_v5 = vpop.eup %1163  ;;  %1175 = vrsqrt.f32 %v1339_v1  ;;  %v551_v6 = vmul.f32 %v1051_v3, %v1051_v3  ;;  %v1075_v7 = vpop.f32.mrb[8].mxu1  ;;  %v604_v9 = vmul.f32 %v1162_v2, %v1314_v36  ;;  %vm626_vm14 = vcmp.eq.f32.partialorder %v1339_v1, inf }
  0xfb   : > { %v381_v8 = vpop.f32.mrb[9].mxu0  ;;  %v1166_v11 = vpop.eup %1165  ;;  %v567_v12 = vmul.f32 %v1075_v7, %v1075_v7  ;;  %v590_v16 = vmul.f32 %v1164_v5, %v1316_v40  ;;  %vm628_vm15 = vcmp.eq.f32.partialorder %v1339_v1, 0.0  ;;  %v629_v7 = vand.u32 2147483648, %v1339_v1 }
  0xfc   : > { %v549_v13 = vmul.f32 %v381_v8, %v381_v8  ;;  %v510_v14 = vpop.f32.mrb[9].mxu1  ;;  %v1052_v15 = vpop.f32.mrb[10].mxu0  ;;  %v606_v23 = vsel %vm605_vm1, %v1314_v36, %v604_v9  ;;  %v611_v24 = vmul.f32 %v1166_v11, %v1319_v42  ;;  %vm642_vm0 = vcmp.eq.f32.partialorder %v1334_v62, 0.0 }
  0xfd   : > { %v1168_v18 = vpop.eup %1167  ;;  %v565_v19 = vmul.f32 %v510_v14, %v510_v14  ;;  %v552_v20 = vmul.f32 %v1052_v15, %v1052_v15  ;;  %v1076_v21 = vpop.f32.mrb[10].mxu1  ;;  %v1357_v25 = vadd.f32 %v567_v12, %v551_v6  ;;  %v592_v32 = vsel %vm591_vm2, %v1316_v40, %v590_v16 }
  0xfe   : > { %v384_v22 = vpop.f32.mrb[11].mxu0  ;;  %v568_v26 = vmul.f32 %v1076_v21, %v1076_v21  ;;  %v513_v28 = vpop.f32.mrb[11].mxu1  ;;  %v597_v33 = vmul.f32 %v1168_v18, %v1322_v43  ;;  %v609_v35 = vsel %vm607_vm3, %v608_v0, %v606_v23  ;;  %v613_v37 = vsel %vm612_vm6, %v1319_v42, %v611_v24 }
  0xff   : > { %v550_v27 = vmul.f32 %v384_v22, %v384_v22  ;;  %v1361_v30 = vadd.f32 %v565_v19, %v549_v13  ;;  %v566_v31 = vmul.f32 %v513_v28, %v513_v28  ;;  %1177 = vrsqrt.f32 %v1357_v25 }
 0x100   : > { %v1370_v34 = vadd.f32 %v568_v26, %v552_v20  ;;  %v599_v39 = vsel %vm598_vm5, %v1322_v43, %v597_v33  ;;  %v616_v41 = vsel %vm614_vm8, %v615_v10, %v613_v37  ;;  %v595_v45 = vsel %vm593_vm4, %v594_v63, %v592_v32 }
 0x101   : > { %1179 = vrsqrt.f32 %v1361_v30  ;;  %v1378_v38 = vadd.f32 %v566_v31, %v550_v27  ;;  %v1170_v44 = vpop.eup %1169  ;;  %v1055_v36 = vpop.f32.mrb[12].mxu0  ;;  %v602_v46 = vsel %vm600_vm7, %v601_v4, %v599_v39  ;;  %v702_v47 = vpack.c.bf16 %v616_v41, %v609_v35 }
 0x102   : > { %1181 = vrsqrt.f32 %v1370_v34  ;;  %v1172_v48 = vpop.eup %1171  ;;  %v555_v42 = vmul.f32 %v1055_v36, %v1055_v36  ;;  %v1079_v49 = vpop.f32.mrb[12].mxu1  ;;  %v701_v51 = vpack.c.bf16 %v602_v46, %v595_v45  ;;  %v632_v57 = vmul.f32 %v1170_v44, %v1326_v56 }
 0x103   : > { %1183 = vrsqrt.f32 %v1378_v38  ;;  %v397_v50 = vpop.f32.mrb[13].mxu0  ;;  %v1174_v52 = vpop.eup %1173  ;;  %v571_v53 = vmul.f32 %v1079_v49, %v1079_v49  ;;  %v618_v43 = vmul.f32 %v1172_v48, %v1329_v60  ;;  %v643_v18 = vand.u32 2147483648, %v1334_v62 }
 0x104   : > { %v553_v54 = vmul.f32 %v397_v50, %v397_v50  ;;  %v526_v40 = vpop.f32.mrb[13].mxu1  ;;  %v1056_v55 = vpop.f32.mrb[14].mxu0  ;;  %1097 = vmatprep.mubr.bf16.mxu0 %v701_v51  ;;  %v639_v2 = vmul.f32 %v1174_v52, %v1334_v62  ;;  %v634_v13 = vsel %vm633_vm10, %v1326_v56, %v632_v57  ;;  %vm647_vm1 = vcmp.eq.f32.partialorder %v1361_v30, inf }
 0x105   : > { %v1176_v58 = vpop.eup %1175  ;;  %v569_v59 = vmul.f32 %v526_v40, %v526_v40  ;;  %v556_v61 = vmul.f32 %v1056_v55, %v1056_v55  ;;  %v1080_v63 = vpop.f32.mrb[14].mxu1  ;;  %v1398_v3 = vadd.f32 %v571_v53, %v555_v42  ;;  %1098 = vmatmul.mubr.bf16.vlgmr.msra.gmra.mrb[16].mxu0 %v702_v47  ;;  %v620_v10 = vsel %vm619_vm9, %v1329_v60, %v618_v43 }
 0x106   : > { %v400_v0 = vpop.f32.mrb[15].mxu0  ;;  %v572_v4 = vmul.f32 %v1080_v63, %v1080_v63  ;;  %v529_v6 = vpop.f32.mrb[15].mxu1  ;;  %v625_v11 = vmul.f32 %v1176_v58, %v1339_v1  ;;  %v641_v14 = vsel %vm640_vm11, %v1334_v62, %v639_v2  ;;  %v623_v20 = vsel %vm621_vm12, %v622_v17, %v620_v10 }
 0x107   : > { %v554_v5 = vmul.f32 %v400_v0, %v400_v0  ;;  %v1401_v8 = vadd.f32 %v569_v59, %v553_v54  ;;  %v570_v9 = vmul.f32 %v529_v6, %v529_v6  ;;  %1185 = vrsqrt.f32 %v1398_v3 }
 0x108   : > { %v1408_v12 = vadd.f32 %v572_v4, %v556_v61  ;;  %v627_v16 = vsel %vm626_vm14, %v1339_v1, %v625_v11  ;;  %v637_v24 = vsel %vm635_vm13, %v636_v29, %v634_v13  ;;  %v644_v26 = vsel %vm642_vm0, %v643_v18, %v641_v14 }
 0x109   : > { %1187 = vrsqrt.f32 %v1401_v8  ;;  %v1417_v15 = vadd.f32 %v570_v9, %v554_v5  ;;  %v1178_v19 = vpop.eup %1177  ;;  %v630_v21 = vsel %vm628_vm15, %v629_v7, %v627_v16  ;;  %v704_v28 = vpack.c.bf16 %v644_v26, %v637_v24 }
 0x10a   : > { %1189 = vrsqrt.f32 %v1408_v12  ;;  %v703_v23 = vpack.c.bf16 %v630_v21, %v623_v20  ;;  %vm649_vm2 = vcmp.eq.f32.partialorder %v1361_v30, 0.0  ;;  %v650_v62 = vand.u32 2147483648, %v1361_v30 }
 0x10b   : > { %v1180_v22 = vpop.eup %1179  ;;  %1191 = vrsqrt.f32 %v1417_v15  ;;  %vm654_vm3 = vcmp.eq.f32.partialorder %v1378_v38, inf  ;;  %v660_v17 = vmul.f32 %v1178_v19, %v1357_v25  ;;  %vm661_vm4 = vcmp.eq.f32.partialorder %v1357_v25, inf }
 0x10c   : > { %v1182_v27 = vpop.eup %1181  ;;  %v646_v60 = vmul.f32 %v1180_v22, %v1361_v30  ;;  %1101 = vmatprep.mubr.bf16.mxu0 %v703_v23  ;;  %vm656_vm5 = vcmp.eq.f32.partialorder %v1378_v38, 0.0  ;;  %v657_v32 = vand.u32 2147483648, %v1378_v38  ;;  %vm668_vm6 = vcmp.eq.f32.partialorder %v1370_v34, inf }
 0x10d   : > { %v1184_v1 = vpop.eup %1183  ;;  %1102 = vmatmul.mubr.bf16.gmra.mrb[20].mxu0 %v704_v28  ;;  %v667_v31 = vmul.f32 %v1182_v27, %v1370_v34  ;;  %v662_v33 = vsel %vm661_vm4, %v1357_v25, %v660_v17  ;;  %v664_v37 = vand.u32 2147483648, %v1357_v25  ;;  %v671_v41 = vand.u32 2147483648, %v1370_v34 }
 0x10e   : > { %v648_v56 = vsel %vm647_vm1, %v1361_v30, %v646_v60  ;;  %v653_v29 = vmul.f32 %v1184_v1, %v1378_v38  ;;  %vm663_vm7 = vcmp.eq.f32.partialorder %v1357_v25, 0.0  ;;  %vm670_vm8 = vcmp.eq.f32.partialorder %v1370_v34, 0.0 }
 0x10f   : > { %v669_v39 = vsel %vm668_vm6, %v1370_v34, %v667_v31  ;;  %v651_v44 = vsel %vm649_vm2, %v650_v62, %v648_v56  ;;  %v665_v47 = vsel %vm663_vm7, %v664_v37, %v662_v33  ;;  %vm675_vm9 = vcmp.eq.f32.partialorder %v1401_v8, inf }
 0x110   : > { %v655_v35 = vsel %vm654_vm3, %v1378_v38, %v653_v29  ;;  %v672_v48 = vsel %vm670_vm8, %v671_v41, %v669_v39  ;;  %vm677_vm10 = vcmp.eq.f32.partialorder %v1401_v8, 0.0  ;;  %v678_v25 = vand.u32 2147483648, %v1401_v8 }
 0x111   : > { %v658_v36 = vsel %vm656_vm5, %v657_v32, %v655_v35  ;;  %v1186_v45 = vpop.eup %1185  ;;  %v706_v38 = vpack.c.bf16 %v672_v48, %v665_v47  ;;  %vm689_vm11 = vcmp.eq.f32.partialorder %v1398_v3, inf  ;;  %vm682_vm12 = vcmp.eq.f32.partialorder %v1417_v15, inf }
 0x112   : > { %v705_v46 = vpack.c.bf16 %v658_v36, %v651_v44  ;;  %v688_v49 = vmul.f32 %v1186_v45, %v1398_v3  ;;  %v692_v52 = vand.u32 2147483648, %v1398_v3  ;;  %vm696_vm13 = vcmp.eq.f32.partialorder %v1408_v12, inf }
 0x113   : > { %v1188_v42 = vpop.eup %1187  ;;  %v699_v55 = vand.u32 2147483648, %v1408_v12  ;;  %v685_v43 = vand.u32 2147483648, %v1417_v15  ;;  %vm691_vm14 = vcmp.eq.f32.partialorder %v1398_v3, 0.0  ;;  %vm698_vm15 = vcmp.eq.f32.partialorder %v1408_v12, 0.0 }
 0x114   : > { %v1190_v50 = vpop.eup %1189  ;;  %1105 = vmatprep.mubr.bf16.mxu1 %v705_v46  ;;  %v674_v30 = vmul.f32 %v1188_v42, %v1401_v8  ;;  %v690_v51 = vsel %vm689_vm11, %v1398_v3, %v688_v49  ;;  %vm684_vm0 = vcmp.eq.f32.partialorder %v1417_v15, 0.0 }
 0x115   : > { %v1192_v34 = vpop.eup %1191  ;;  %1106 = vmatmul.mubr.bf16.vlgmr.msra.gmra.mrb[16].mxu1 %v706_v38  ;;  %v695_v53 = vmul.f32 %v1190_v50, %v1408_v12  ;;  %v693_v59 = vsel %vm691_vm14, %v692_v52, %v690_v51 }
 0x116   : > { %v676_v54 = vsel %vm675_vm9, %v1401_v8, %v674_v30  ;;  %v681_v40 = vmul.f32 %v1192_v34, %v1417_v15 }
 0x117   : > { %v697_v57 = vsel %vm696_vm13, %v1408_v12, %v695_v53  ;;  %v679_v63 = vsel %vm677_vm10, %v678_v25, %v676_v54 }
 0x118   : > { %v683_v58 = vsel %vm682_vm12, %v1417_v15, %v681_v40  ;;  %v700_v61 = vsel %vm698_vm15, %v699_v55, %v697_v57 }
 0x119   : > { %v686_v0 = vsel %vm684_vm0, %v685_v43, %v683_v58  ;;  %v708_v2 = vpack.c.bf16 %v700_v61, %v693_v59 }
 0x11a   : > { %v707_v4 = vpack.c.bf16 %v686_v0, %v679_v63 }
 0x11c   : > { %1109 = vmatprep.mubr.bf16.mxu1 %v707_v4 }
 0x11d   : > { %1110 = vmatmul.mubr.bf16.gmra.mrb[20].mxu1 %v708_v2 }
 0x1d8   : > { %v1099_v3 = vpop.f32.mrb[16].mxu0 }
 0x1d9   : > { %872 = vst [vmem:[%s1484_s7 + $0x10] sm:$0xff] %v1099_v3  ;;  %v807_v5 = vpop.f32.mrb[17].mxu0 }
 0x1da   : > { %870 = vst [vmem:[%s1484_s7] sm:$0xff] %v807_v5  ;;  %v1100_v6 = vpop.f32.mrb[18].mxu0 }
 0x1db   : > { %873 = vst [vmem:[%s1484_s7 + $0x18] sm:$0xff] %v1100_v6  ;;  %v810_v7 = vpop.f32.mrb[19].mxu0 }
 0x1dc   : > { %871 = vst [vmem:[%s1484_s7 + $0x8] sm:$0xff] %v810_v7 }
 0x1e0   : > { %v1103_v8 = vpop.f32.mrb[20].mxu0 }
 0x1e1   : > { %876 = vst [vmem:[%s1484_s7 + $0x30] sm:$0xff] %v1103_v8  ;;  %v823_v9 = vpop.f32.mrb[21].mxu0 }
 0x1e2   : > { %874 = vst [vmem:[%s1484_s7 + $0x20] sm:$0xff] %v823_v9  ;;  %v1104_v10 = vpop.f32.mrb[22].mxu0 }
 0x1e3   : > { %877 = vst [vmem:[%s1484_s7 + $0x38] sm:$0xff] %v1104_v10  ;;  %v826_v11 = vpop.f32.mrb[23].mxu0 }
 0x1e4   : > { %875 = vst [vmem:[%s1484_s7 + $0x28] sm:$0xff] %v826_v11 }
 0x1e8   : > { %v1107_v12 = vpop.f32.mrb[16].mxu1 }
 0x1e9   : > { %880 = vst [vmem:[%s1484_s7 + $0x50] sm:$0xff] %v1107_v12  ;;  %v839_v13 = vpop.f32.mrb[17].mxu1 }
 0x1ea   : > { %878 = vst [vmem:[%s1484_s7 + $0x40] sm:$0xff] %v839_v13  ;;  %v1108_v14 = vpop.f32.mrb[18].mxu1 }
 0x1eb   : > { %881 = vst [vmem:[%s1484_s7 + $0x58] sm:$0xff] %v1108_v14  ;;  %v842_v15 = vpop.f32.mrb[19].mxu1 }
 0x1ec   : > { %879 = vst [vmem:[%s1484_s7 + $0x48] sm:$0xff] %v842_v15 }
 0x1f0   : > { %v1111_v16 = vpop.f32.mrb[20].mxu1 }
 0x1f1   : > { %884 = vst [vmem:[%s1484_s7 + $0x70] sm:$0xff] %v1111_v16  ;;  %v855_v18 = vpop.f32.mrb[21].mxu1 }
 0x1f2   : > { %882 = vst [vmem:[%s1484_s7 + $0x60] sm:$0xff] %v855_v18  ;;  %v1112_v19 = vpop.f32.mrb[22].mxu1 }
 0x1f3   : > { %885 = vst [vmem:[%s1484_s7 + $0x78] sm:$0xff] %v1112_v19  ;;  %v858_v20 = vpop.f32.mrb[23].mxu1 }
 0x1f4   : > { %883 = vst [vmem:[%s1484_s7 + $0x68] sm:$0xff] %v858_v20 }
 0x1f5 PF: > { %s14_s15 = sadd.s32 1, %s1199_s15  }
 0x1f6   : > { %p11_p4 = scmp.ge.s32.totalorder %s14_s15, 4  }
 0x1f8   :  { %13 = sbr.rel (!%p11_p4) target bundleno = 1 (0x1), region = 66 }

// kernel: multiscale_stft_forward.4
= control target key start
LH: loop header
LB: loop body
LE: loop exit
PB: predicated region body
PF: predicated region fallthrough
CT: control target
= control target key end

     0   :  { %s1344_s1 = inlined_call_operand.vmem [shape: bf16[128,128], index: 1, kind: input, shape index: {}]   ;;  %s1345_s2 = inlined_call_operand.vmem [shape: bf16[128,128], index: 2, kind: input, shape index: {}]   ;;  %s1346_s0 = inlined_call_operand.vmem [shape: bf16[128,128], index: 0, kind: input, shape index: {}]   ;;  %s1347_s3 = inlined_call_operand.vmem [shape: bf16[128,128], index: 3, kind: input, shape index: {}]   ;;  %s1348_s4 = inlined_call_operand.vmem [shape: f32[128,128], index: 4, kind: output, shape index: {}]  }
   0x1   :  { %v945_v0 = vld [vmem:[%s1344_s1] sm:$0xff]   ;;  %v947_v2 = vld [vmem:[%s1344_s1 + $0x8] sm:$0xff]   ;;  %v949_v4 = vld [vmem:[%s1344_s1 + $0x10] sm:$0xff]  }
   0x2   :  { %v946_v1 = vld [vmem:[%s1345_s2] sm:$0xff]   ;;  %833 = vmatprep.subr.bf16.mxu0 %v945_v0  ;;  %v948_v3 = vld [vmem:[%s1345_s2 + $0x8] sm:$0xff]   ;;  %v950_v5 = vld [vmem:[%s1345_s2 + $0x10] sm:$0xff]  }
   0x3   :  { %865 = vmatprep.subr.bf16.mxu1 %v946_v1  ;;  %834 = vmatpush3.bf16.msra.mxu0 %v945_v0  ;;  %v951_v6 = vld [vmem:[%s1344_s1 + $0x18] sm:$0xff]   ;;  %v953_v8 = vld [vmem:[%s1344_s1 + $0x20] sm:$0xff]   ;;  %v955_v10 = vld [vmem:[%s1344_s1 + $0x28] sm:$0xff]  }
   0x4   :  { %866 = vmatpush3.bf16.msra.mxu1 %v946_v1  ;;  %835 = vmatprep.subr.bf16.mxu0 %v947_v2  ;;  %v952_v7 = vld [vmem:[%s1345_s2 + $0x18] sm:$0xff]   ;;  %v954_v9 = vld [vmem:[%s1345_s2 + $0x20] sm:$0xff]   ;;  %v956_v12 = vld [vmem:[%s1345_s2 + $0x28] sm:$0xff]  }
   0x5   :  { %867 = vmatprep.subr.bf16.mxu1 %v948_v3  ;;  %v961_v11 = vld [vmem:[%s1346_s0] sm:$0xff]   ;;  %v957_v13 = vld [vmem:[%s1344_s1 + $0x30] sm:$0xff]   ;;  %v959_v15 = vld [vmem:[%s1344_s1 + $0x38] sm:$0xff]  }
   0x6   :  { %849 = vmatprep.mubr.bf16.mxu0 %v961_v11  ;;  %881 = vmatprep.mubr.bf16.mxu1 %v961_v11  ;;  %v958_v14 = vld [vmem:[%s1345_s2 + $0x30] sm:$0xff]   ;;  %v960_v16 = vld [vmem:[%s1345_s2 + $0x38] sm:$0xff]   ;;  %v969_v17 = vld [vmem:[%s1347_s3] sm:$0xff]  }
   0x7   :  { %836 = vmatpush3.bf16.msra.mxu0 %v947_v2  ;;  %v962_v18 = vld [vmem:[%s1346_s0 + $0x8] sm:$0xff]   ;;  %v963_v19 = vld [vmem:[%s1346_s0 + $0x10] sm:$0xff]   ;;  %v964_v21 = vld [vmem:[%s1346_s0 + $0x18] sm:$0xff]  }
   0x8   :  { %868 = vmatpush3.bf16.msra.mxu1 %v948_v3  ;;  %837 = vmatprep.subr.bf16.mxu0 %v949_v4  ;;  %v970_v20 = vld [vmem:[%s1347_s3 + $0x8] sm:$0xff]   ;;  %v965_v22 = vld [vmem:[%s1346_s0 + $0x20] sm:$0xff]   ;;  %v967_v24 = vld [vmem:[%s1346_s0 + $0x30] sm:$0xff]  }
   0x9   :  { %869 = vmatprep.subr.bf16.mxu1 %v950_v5  ;;  %v966_v23 = vld [vmem:[%s1346_s0 + $0x28] sm:$0xff]   ;;  %v968_v25 = vld [vmem:[%s1346_s0 + $0x38] sm:$0xff]   ;;  %v971_v26 = vld [vmem:[%s1347_s3 + $0x10] sm:$0xff]  }
   0xa   :  { %v972_v27 = vld [vmem:[%s1347_s3 + $0x18] sm:$0xff]   ;;  %v973_v28 = vld [vmem:[%s1347_s3 + $0x20] sm:$0xff]   ;;  %v974_v29 = vld [vmem:[%s1347_s3 + $0x28] sm:$0xff]  }
   0xb   :  { %838 = vmatpush3.bf16.msra.mxu0 %v949_v4  ;;  %v975_v30 = vld [vmem:[%s1347_s3 + $0x30] sm:$0xff]   ;;  %v976_v31 = vld [vmem:[%s1347_s3 + $0x38] sm:$0xff]  }
   0xc   :  { %870 = vmatpush3.bf16.msra.mxu1 %v950_v5  ;;  %839 = vmatprep.subr.bf16.mxu0 %v951_v6 }
   0xd   :  { %871 = vmatprep.subr.bf16.mxu1 %v952_v7 }
   0xf   :  { %840 = vmatpush3.bf16.msra.mxu0 %v951_v6 }
  0x10   :  { %872 = vmatpush3.bf16.msra.mxu1 %v952_v7  ;;  %841 = vmatprep.subr.bf16.mxu0 %v953_v8 }
  0x11   :  { %873 = vmatprep.subr.bf16.mxu1 %v954_v9 }
  0x13   :  { %842 = vmatpush3.bf16.msra.mxu0 %v953_v8 }
  0x14   :  { %874 = vmatpush3.bf16.msra.mxu1 %v954_v9  ;;  %843 = vmatprep.subr.bf16.mxu0 %v955_v10 }
  0x15   :  { %875 = vmatprep.subr.bf16.mxu1 %v956_v12 }
  0x17   :  { %844 = vmatpush3.bf16.msra.mxu0 %v955_v10 }
  0x18   :  { %876 = vmatpush3.bf16.msra.mxu1 %v956_v12  ;;  %845 = vmatprep.subr.bf16.mxu0 %v957_v13 }
  0x19   :  { %877 = vmatprep.subr.bf16.mxu1 %v958_v14 }
  0x1b   :  { %846 = vmatpush3.bf16.msra.mxu0 %v957_v13 }
  0x1c   :  { %878 = vmatpush3.bf16.msra.mxu1 %v958_v14  ;;  %847 = vmatprep.subr.bf16.mxu0 %v959_v15 }
  0x1d   :  { %879 = vmatprep.subr.bf16.mxu1 %v960_v16 }
  0x1f   :  { %848 = vmatpush3.bf16.msra.mxu0 %v959_v15 }
  0x20   :  { %880 = vmatpush3.bf16.msra.mxu1 %v960_v16  ;;  %897 = vmatprep.subr.bf16.mxu0 %v969_v17 }
  0x21   :  { %929 = vmatprep.subr.bf16.mxu1 %v969_v17 }
  0x22   :  { %850 = vmatmul.mubr.bf16.vlgmr.msra.gmra.mrb[0].mxu0 %v962_v18 }
  0x23   :  { %882 = vmatmul.mubr.bf16.vlgmr.msra.gmra.mrb[0].mxu1 %v962_v18  ;;  %853 = vmatprep.mubr.bf16.mxu0 %v963_v19 }
  0x24   :  { %885 = vmatprep.mubr.bf16.mxu1 %v963_v19  ;;  %898 = vmatpush3.bf16.msra.mxu0 %v969_v17 }
  0x25   :  { %899 = vmatprep.subr.bf16.mxu0 %v970_v20  ;;  %937 = vmatpush3.bf16.msra.mxu1 %v969_v17 }
  0x26   :  { %930 = vmatprep.subr.bf16.mxu1 %v970_v20 }
  0x28   :  { %900 = vmatpush3.bf16.msra.mxu0 %v970_v20 }
  0x29   :  { %938 = vmatpush3.bf16.msra.mxu1 %v970_v20  ;;  %901 = vmatprep.subr.bf16.mxu0 %v971_v26 }
  0x2a   :  { %854 = vmatmul.mubr.bf16.gmra.mrb[4].mxu0 %v964_v21  ;;  %931 = vmatprep.subr.bf16.mxu1 %v971_v26 }
  0x2b   :  { %886 = vmatmul.mubr.bf16.gmra.mrb[4].mxu1 %v964_v21  ;;  %857 = vmatprep.mubr.bf16.mxu0 %v965_v22 }
  0x2c   :  { %889 = vmatprep.mubr.bf16.mxu1 %v965_v22  ;;  %902 = vmatpush3.bf16.msra.mxu0 %v971_v26 }
  0x2d   :  { %939 = vmatpush3.bf16.msra.mxu1 %v971_v26  ;;  %903 = vmatprep.subr.bf16.mxu0 %v972_v27 }
  0x2e   :  { %932 = vmatprep.subr.bf16.mxu1 %v972_v27 }
  0x30   :  { %904 = vmatpush3.bf16.msra.mxu0 %v972_v27 }
  0x31   :  { %940 = vmatpush3.bf16.msra.mxu1 %v972_v27  ;;  %905 = vmatprep.subr.bf16.mxu0 %v973_v28 }
  0x32   :  { %858 = vmatmul.mubr.bf16.gmra.mrb[8].mxu0 %v966_v23  ;;  %933 = vmatprep.subr.bf16.mxu1 %v973_v28 }
  0x33   :  { %890 = vmatmul.mubr.bf16.gmra.mrb[8].mxu1 %v966_v23  ;;  %861 = vmatprep.mubr.bf16.mxu0 %v967_v24 }
  0x34   :  { %893 = vmatprep.mubr.bf16.mxu1 %v967_v24  ;;  %906 = vmatpush3.bf16.msra.mxu0 %v973_v28 }
  0x35   :  { %941 = vmatpush3.bf16.msra.mxu1 %v973_v28  ;;  %907 = vmatprep.subr.bf16.mxu0 %v974_v29 }
  0x36   :  { %934 = vmatprep.subr.bf16.mxu1 %v974_v29 }
  0x38   :  { %908 = vmatpush3.bf16.msra.mxu0 %v974_v29 }
  0x39   :  { %942 = vmatpush3.bf16.msra.mxu1 %v974_v29  ;;  %909 = vmatprep.subr.bf16.mxu0 %v975_v30 }
  0x3a   :  { %862 = vmatmul.mubr.bf16.gmra.mrb[12].mxu0 %v968_v25  ;;  %935 = vmatprep.subr.bf16.mxu1 %v975_v30 }
  0x3b   :  { %894 = vmatmul.mubr.bf16.gmra.mrb[12].mxu1 %v968_v25 }
  0x3c   :  { %910 = vmatpush3.bf16.msra.mxu0 %v975_v30 }
  0x3d   :  { %943 = vmatpush3.bf16.msra.mxu1 %v975_v30  ;;  %911 = vmatprep.subr.bf16.mxu0 %v976_v31 }
  0x3e   :  { %936 = vmatprep.subr.bf16.mxu1 %v976_v31 }
  0x40   :  { %912 = vmatpush3.bf16.msra.mxu0 %v976_v31 }
  0x41   :  { %944 = vmatpush3.bf16.msra.mxu1 %v976_v31 }
  0xf5   :  { %v851_v32 = vpop.f32.mrb[0].mxu0 }
  0xf6   :  { %v406_v33 = vmul.f32 %v851_v32, %v851_v32  ;;  %v883_v34 = vpop.f32.mrb[0].mxu1  ;;  %v180_v35 = vpop.f32.mrb[1].mxu0 }
  0xf7   :  { %v422_v36 = vmul.f32 %v883_v34, %v883_v34  ;;  %v404_v37 = vmul.f32 %v180_v35, %v180_v35  ;;  %v341_v38 = vpop.f32.mrb[1].mxu1  ;;  %v852_v39 = vpop.f32.mrb[2].mxu0 }
  0xf8   :  { %v420_v40 = vmul.f32 %v341_v38, %v341_v38  ;;  %v407_v41 = vmul.f32 %v852_v39, %v852_v39  ;;  %v884_v42 = vpop.f32.mrb[2].mxu1  ;;  %v183_v43 = vpop.f32.mrb[3].mxu0 }
  0xf9   :  { %v1130_v44 = vadd.f32 %v422_v36, %v406_v33  ;;  %v423_v45 = vmul.f32 %v884_v42, %v884_v42  ;;  %v405_v46 = vmul.f32 %v183_v43, %v183_v43  ;;  %v344_v47 = vpop.f32.mrb[3].mxu1 }
  0xfa   :  { %v1132_v48 = vadd.f32 %v420_v40, %v404_v37  ;;  %v421_v49 = vmul.f32 %v344_v47, %v344_v47 }
  0xfb   :  { %977 = vrsqrt.f32 %v1130_v44  ;;  %v1135_v50 = vadd.f32 %v423_v45, %v407_v41  ;;  %vm468_vm0 = vcmp.eq.f32.partialorder %v1130_v44, inf  ;;  %vm470_vm2 = vcmp.eq.f32.partialorder %v1130_v44, 0.0 }
  0xfc   :  { %979 = vrsqrt.f32 %v1132_v48  ;;  %v1138_v51 = vadd.f32 %v421_v49, %v405_v46  ;;  %vm454_vm1 = vcmp.eq.f32.partialorder %v1132_v48, inf  ;;  %v457_v7 = vand.u32 2147483648, %v1132_v48 }
  0xfd   :  { %981 = vrsqrt.f32 %v1135_v50  ;;  %v855_v52 = vpop.f32.mrb[4].mxu0  ;;  %v471_v8 = vand.u32 2147483648, %v1130_v44  ;;  %vm456_vm3 = vcmp.eq.f32.partialorder %v1132_v48, 0.0  ;;  %vm475_vm5 = vcmp.eq.f32.partialorder %v1135_v50, inf }
  0xfe   :  { %983 = vrsqrt.f32 %v1138_v51  ;;  %v410_v53 = vmul.f32 %v855_v52, %v855_v52  ;;  %v887_v54 = vpop.f32.mrb[4].mxu1  ;;  %v196_v55 = vpop.f32.mrb[5].mxu0  ;;  %vm461_vm4 = vcmp.eq.f32.partialorder %v1138_v51, inf  ;;  %vm463_vm6 = vcmp.eq.f32.partialorder %v1138_v51, 0.0 }
  0xff   :  { %v426_v56 = vmul.f32 %v887_v54, %v887_v54  ;;  %v408_v57 = vmul.f32 %v196_v55, %v196_v55  ;;  %v357_v58 = vpop.f32.mrb[5].mxu1  ;;  %v856_v59 = vpop.f32.mrb[6].mxu0  ;;  %v464_v12 = vand.u32 2147483648, %v1138_v51  ;;  %vm477_vm7 = vcmp.eq.f32.partialorder %v1135_v50, 0.0 }
 0x100   :  { %v424_v60 = vmul.f32 %v357_v58, %v357_v58  ;;  %v411_v61 = vmul.f32 %v856_v59, %v856_v59  ;;  %v888_v62 = vpop.f32.mrb[6].mxu1  ;;  %v199_v63 = vpop.f32.mrb[7].mxu0  ;;  %v478_v18 = vand.u32 2147483648, %v1135_v50 }
 0x101   :  { %v1142_v0 = vadd.f32 %v426_v56, %v410_v53  ;;  %v427_v1 = vmul.f32 %v888_v62, %v888_v62  ;;  %v409_v2 = vmul.f32 %v199_v63, %v199_v63  ;;  %v360_v3 = vpop.f32.mrb[7].mxu1 }
 0x102   :  { %v1145_v4 = vadd.f32 %v424_v60, %v408_v57  ;;  %v425_v5 = vmul.f32 %v360_v3, %v360_v3 }
 0x103   :  { %985 = vrsqrt.f32 %v1142_v0  ;;  %v1150_v6 = vadd.f32 %v427_v1, %v411_v61  ;;  %v499_v37 = vand.u32 2147483648, %v1142_v0  ;;  %vm496_vm9 = vcmp.eq.f32.partialorder %v1142_v0, inf }
 0x104   :  { %987 = vrsqrt.f32 %v1145_v4  ;;  %v1155_v9 = vadd.f32 %v425_v5, %v409_v2  ;;  %v485_v25 = vand.u32 2147483648, %v1145_v4  ;;  %vm482_vm8 = vcmp.eq.f32.partialorder %v1145_v4, inf }
 0x105   :  { %v978_v10 = vpop.eup %977  ;;  %989 = vrsqrt.f32 %v1150_v6  ;;  %v859_v11 = vpop.f32.mrb[8].mxu0  ;;  %vm503_vm10 = vcmp.eq.f32.partialorder %v1150_v6, inf  ;;  %vm484_vm11 = vcmp.eq.f32.partialorder %v1145_v4, 0.0  ;;  %vm498_vm12 = vcmp.eq.f32.partialorder %v1142_v0, 0.0 }
 0x106   :  { %v980_v13 = vpop.eup %979  ;;  %991 = vrsqrt.f32 %v1155_v9  ;;  %v414_v14 = vmul.f32 %v859_v11, %v859_v11  ;;  %v891_v15 = vpop.f32.mrb[8].mxu1  ;;  %v467_v17 = vmul.f32 %v978_v10, %v1130_v44  ;;  %vm489_vm13 = vcmp.eq.f32.partialorder %v1155_v9, inf }
 0x107   :  { %v212_v16 = vpop.f32.mrb[9].mxu0  ;;  %v982_v19 = vpop.eup %981  ;;  %v430_v20 = vmul.f32 %v891_v15, %v891_v15  ;;  %v453_v24 = vmul.f32 %v980_v13, %v1132_v48  ;;  %vm491_vm14 = vcmp.eq.f32.partialorder %v1155_v9, 0.0  ;;  %v492_v15 = vand.u32 2147483648, %v1155_v9 }
 0x108   :  { %v412_v21 = vmul.f32 %v212_v16, %v212_v16  ;;  %v373_v22 = vpop.f32.mrb[9].mxu1  ;;  %v860_v23 = vpop.f32.mrb[10].mxu0  ;;  %v469_v31 = vsel %vm468_vm0, %v1130_v44, %v467_v17  ;;  %v474_v32 = vmul.f32 %v982_v19, %v1135_v50  ;;  %vm505_vm15 = vcmp.eq.f32.partialorder %v1150_v6, 0.0 }
 0x109   :  { %v984_v26 = vpop.eup %983  ;;  %v428_v27 = vmul.f32 %v373_v22, %v373_v22  ;;  %v415_v28 = vmul.f32 %v860_v23, %v860_v23  ;;  %v892_v29 = vpop.f32.mrb[10].mxu1  ;;  %v1173_v33 = vadd.f32 %v430_v20, %v414_v14  ;;  %v455_v40 = vsel %vm454_vm1, %v1132_v48, %v453_v24 }
 0x10a   :  { %v215_v30 = vpop.f32.mrb[11].mxu0  ;;  %v431_v34 = vmul.f32 %v892_v29, %v892_v29  ;;  %v376_v36 = vpop.f32.mrb[11].mxu1  ;;  %v460_v41 = vmul.f32 %v984_v26, %v1138_v51  ;;  %v472_v43 = vsel %vm470_vm2, %v471_v8, %v469_v31  ;;  %v476_v45 = vsel %vm475_vm5, %v1135_v50, %v474_v32 }
 0x10b   :  { %v413_v35 = vmul.f32 %v215_v30, %v215_v30  ;;  %v1177_v38 = vadd.f32 %v428_v27, %v412_v21  ;;  %v429_v39 = vmul.f32 %v376_v36, %v376_v36  ;;  %993 = vrsqrt.f32 %v1173_v33 }
 0x10c   :  { %v1186_v42 = vadd.f32 %v431_v34, %v415_v28  ;;  %v462_v47 = vsel %vm461_vm4, %v1138_v51, %v460_v41  ;;  %v479_v49 = vsel %vm477_vm7, %v478_v18, %v476_v45  ;;  %v458_v53 = vsel %vm456_vm3, %v457_v7, %v455_v40 }
 0x10d   :  { %995 = vrsqrt.f32 %v1177_v38  ;;  %v1194_v46 = vadd.f32 %v429_v39, %v413_v35  ;;  %v986_v52 = vpop.eup %985  ;;  %v863_v44 = vpop.f32.mrb[12].mxu0  ;;  %v465_v54 = vsel %vm463_vm6, %v464_v12, %v462_v47  ;;  %v565_v55 = vpack.c.bf16 %v479_v49, %v472_v43 }
 0x10e   :  { %997 = vrsqrt.f32 %v1186_v42  ;;  %v988_v56 = vpop.eup %987  ;;  %v418_v50 = vmul.f32 %v863_v44, %v863_v44  ;;  %v895_v57 = vpop.f32.mrb[12].mxu1  ;;  %v564_v59 = vpack.c.bf16 %v465_v54, %v458_v53  ;;  %v495_v1 = vmul.f32 %v986_v52, %v1142_v0 }
 0x10f   :  { %999 = vrsqrt.f32 %v1194_v46  ;;  %v228_v58 = vpop.f32.mrb[13].mxu0  ;;  %v990_v60 = vpop.eup %989  ;;  %v434_v61 = vmul.f32 %v895_v57, %v895_v57  ;;  %v481_v51 = vmul.f32 %v988_v56, %v1145_v4  ;;  %v506_v26 = vand.u32 2147483648, %v1150_v6 }
 0x110   :  { %v416_v62 = vmul.f32 %v228_v58, %v228_v58  ;;  %v389_v48 = vpop.f32.mrb[13].mxu1  ;;  %v864_v63 = vpop.f32.mrb[14].mxu0  ;;  %913 = vmatprep.mubr.bf16.mxu0 %v564_v59  ;;  %v502_v10 = vmul.f32 %v990_v60, %v1150_v6  ;;  %v497_v21 = vsel %vm496_vm9, %v1142_v0, %v495_v1  ;;  %vm510_vm0 = vcmp.eq.f32.partialorder %v1177_v38, inf }
 0x111   :  { %v992_v2 = vpop.eup %991  ;;  %v432_v3 = vmul.f32 %v389_v48, %v389_v48  ;;  %v419_v5 = vmul.f32 %v864_v63, %v864_v63  ;;  %v896_v7 = vpop.f32.mrb[14].mxu1  ;;  %v1214_v11 = vadd.f32 %v434_v61, %v418_v50  ;;  %914 = vmatmul.mubr.bf16.vlgmr.msra.gmra.mrb[16].mxu0 %v565_v55  ;;  %v483_v18 = vsel %vm482_vm8, %v1145_v4, %v481_v51 }
 0x112   :  { %v231_v8 = vpop.f32.mrb[15].mxu0  ;;  %v435_v12 = vmul.f32 %v896_v7, %v896_v7  ;;  %v392_v14 = vpop.f32.mrb[15].mxu1  ;;  %v488_v19 = vmul.f32 %v992_v2, %v1155_v9  ;;  %v504_v22 = vsel %vm503_vm10, %v1150_v6, %v502_v10  ;;  %v486_v28 = vsel %vm484_vm11, %v485_v25, %v483_v18 }
 0x113   :  { %v417_v13 = vmul.f32 %v231_v8, %v231_v8  ;;  %v1217_v16 = vadd.f32 %v432_v3, %v416_v62  ;;  %v433_v17 = vmul.f32 %v392_v14, %v392_v14  ;;  %1001 = vrsqrt.f32 %v1214_v11 }
 0x114   :  { %v1224_v20 = vadd.f32 %v435_v12, %v419_v5  ;;  %v490_v24 = vsel %vm489_vm13, %v1155_v9, %v488_v19  ;;  %v500_v32 = vsel %vm498_vm12, %v499_v37, %v497_v21  ;;  %v507_v34 = vsel %vm505_vm15, %v506_v26, %v504_v22 }
 0x115   :  { %1003 = vrsqrt.f32 %v1217_v16  ;;  %v1233_v23 = vadd.f32 %v433_v17, %v417_v13  ;;  %v994_v27 = vpop.eup %993  ;;  %v493_v29 = vsel %vm491_vm14, %v492_v15, %v490_v24  ;;  %v567_v36 = vpack.c.bf16 %v507_v34, %v500_v32 }
 0x116   :  { %1005 = vrsqrt.f32 %v1224_v20  ;;  %v566_v31 = vpack.c.bf16 %v493_v29, %v486_v28  ;;  %vm512_vm1 = vcmp.eq.f32.partialorder %v1177_v38, 0.0  ;;  %v513_v6 = vand.u32 2147483648, %v1177_v38 }
 0x117   :  { %v996_v30 = vpop.eup %995  ;;  %1007 = vrsqrt.f32 %v1233_v23  ;;  %vm517_vm2 = vcmp.eq.f32.partialorder %v1194_v46, inf  ;;  %v523_v25 = vmul.f32 %v994_v27, %v1173_v33  ;;  %vm524_vm3 = vcmp.eq.f32.partialorder %v1173_v33, inf }
 0x118   :  { %v998_v35 = vpop.eup %997  ;;  %v509_v4 = vmul.f32 %v996_v30, %v1177_v38  ;;  %917 = vmatprep.mubr.bf16.mxu0 %v566_v31  ;;  %vm519_vm4 = vcmp.eq.f32.partialorder %v1194_v46, 0.0  ;;  %v520_v40 = vand.u32 2147483648, %v1194_v46  ;;  %vm531_vm5 = vcmp.eq.f32.partialorder %v1186_v42, inf }
 0x119   :  { %v1000_v9 = vpop.eup %999  ;;  %918 = vmatmul.mubr.bf16.gmra.mrb[20].mxu0 %v567_v36  ;;  %v530_v39 = vmul.f32 %v998_v35, %v1186_v42  ;;  %v525_v41 = vsel %vm524_vm3, %v1173_v33, %v523_v25  ;;  %v527_v45 = vand.u32 2147483648, %v1173_v33  ;;  %v534_v49 = vand.u32 2147483648, %v1186_v42 }
 0x11a   :  { %v511_v0 = vsel %vm510_vm0, %v1177_v38, %v509_v4  ;;  %v516_v37 = vmul.f32 %v1000_v9, %v1194_v46  ;;  %vm526_vm6 = vcmp.eq.f32.partialorder %v1173_v33, 0.0  ;;  %vm533_vm7 = vcmp.eq.f32.partialorder %v1186_v42, 0.0 }
 0x11b   :  { %v532_v47 = vsel %vm531_vm5, %v1186_v42, %v530_v39  ;;  %v514_v52 = vsel %vm512_vm1, %v513_v6, %v511_v0  ;;  %v528_v55 = vsel %vm526_vm6, %v527_v45, %v525_v41  ;;  %vm538_vm8 = vcmp.eq.f32.partialorder %v1217_v16, inf }
 0x11c   :  { %v518_v43 = vsel %vm517_vm2, %v1194_v46, %v516_v37  ;;  %v535_v56 = vsel %vm533_vm7, %v534_v49, %v532_v47  ;;  %vm540_vm9 = vcmp.eq.f32.partialorder %v1217_v16, 0.0  ;;  %v541_v33 = vand.u32 2147483648, %v1217_v16 }
 0x11d   :  { %v521_v44 = vsel %vm519_vm4, %v520_v40, %v518_v43  ;;  %v1002_v53 = vpop.eup %1001  ;;  %v569_v46 = vpack.c.bf16 %v535_v56, %v528_v55  ;;  %vm552_vm10 = vcmp.eq.f32.partialorder %v1214_v11, inf  ;;  %vm545_vm11 = vcmp.eq.f32.partialorder %v1233_v23, inf }
 0x11e   :  { %v568_v54 = vpack.c.bf16 %v521_v44, %v514_v52  ;;  %v551_v57 = vmul.f32 %v1002_v53, %v1214_v11  ;;  %v555_v60 = vand.u32 2147483648, %v1214_v11  ;;  %vm559_vm12 = vcmp.eq.f32.partialorder %v1224_v20, inf }
 0x11f   :  { %v1004_v50 = vpop.eup %1003  ;;  %v562_v63 = vand.u32 2147483648, %v1224_v20  ;;  %v548_v51 = vand.u32 2147483648, %v1233_v23  ;;  %vm554_vm13 = vcmp.eq.f32.partialorder %v1214_v11, 0.0  ;;  %vm561_vm14 = vcmp.eq.f32.partialorder %v1224_v20, 0.0 }
 0x120   :  { %v1006_v58 = vpop.eup %1005  ;;  %921 = vmatprep.mubr.bf16.mxu1 %v568_v54  ;;  %v537_v38 = vmul.f32 %v1004_v50, %v1217_v16  ;;  %v553_v59 = vsel %vm552_vm10, %v1214_v11, %v551_v57  ;;  %vm547_vm15 = vcmp.eq.f32.partialorder %v1233_v23, 0.0 }
 0x121   :  { %v1008_v42 = vpop.eup %1007  ;;  %922 = vmatmul.mubr.bf16.vlgmr.msra.gmra.mrb[16].mxu1 %v569_v46  ;;  %v558_v61 = vmul.f32 %v1006_v58, %v1224_v20  ;;  %v556_v3 = vsel %vm554_vm13, %v555_v60, %v553_v59 }
 0x122   :  { %v539_v62 = vsel %vm538_vm8, %v1217_v16, %v537_v38  ;;  %v544_v48 = vmul.f32 %v1008_v42, %v1233_v23 }
 0x123   :  { %v560_v1 = vsel %vm559_vm12, %v1224_v20, %v558_v61  ;;  %v542_v7 = vsel %vm540_vm9, %v541_v33, %v539_v62 }
 0x124   :  { %v546_v2 = vsel %vm545_vm11, %v1233_v23, %v544_v48  ;;  %v563_v5 = vsel %vm561_vm14, %v562_v63, %v560_v1 }
 0x125   :  { %v549_v8 = vsel %vm547_vm15, %v548_v51, %v546_v2  ;;  %v571_v10 = vpack.c.bf16 %v563_v5, %v556_v3 }
 0x126   :  { %v570_v12 = vpack.c.bf16 %v549_v8, %v542_v7 }
 0x128   :  { %925 = vmatprep.mubr.bf16.mxu1 %v570_v12 }
 0x129   :  { %926 = vmatmul.mubr.bf16.gmra.mrb[20].mxu1 %v571_v10 }
 0x1e4   :  { %v915_v13 = vpop.f32.mrb[16].mxu0 }
 0x1e5   :  { %735 = vst [vmem:[%s1348_s4 + $0x10] sm:$0xff] %v915_v13  ;;  %v670_v11 = vpop.f32.mrb[17].mxu0 }
 0x1e6   :  { %733 = vst [vmem:[%s1348_s4] sm:$0xff] %v670_v11  ;;  %v916_v14 = vpop.f32.mrb[18].mxu0 }
 0x1e7   :  { %736 = vst [vmem:[%s1348_s4 + $0x18] sm:$0xff] %v916_v14  ;;  %v673_v15 = vpop.f32.mrb[19].mxu0 }
 0x1e8   :  { %734 = vst [vmem:[%s1348_s4 + $0x8] sm:$0xff] %v673_v15 }
 0x1ec   :  { %v919_v16 = vpop.f32.mrb[20].mxu0 }
 0x1ed   :  { %739 = vst [vmem:[%s1348_s4 + $0x30] sm:$0xff] %v919_v16  ;;  %v686_v17 = vpop.f32.mrb[21].mxu0 }
 0x1ee   :  { %737 = vst [vmem:[%s1348_s4 + $0x20] sm:$0xff] %v686_v17  ;;  %v920_v18 = vpop.f32.mrb[22].mxu0 }
 0x1ef   :  { %740 = vst [vmem:[%s1348_s4 + $0x38] sm:$0xff] %v920_v18  ;;  %v689_v19 = vpop.f32.mrb[23].mxu0 }
 0x1f0   :  { %738 = vst [vmem:[%s1348_s4 + $0x28] sm:$0xff] %v689_v19 }
 0x1f4   :  { %v923_v20 = vpop.f32.mrb[16].mxu1 }
 0x1f5   :  { %743 = vst [vmem:[%s1348_s4 + $0x50] sm:$0xff] %v923_v20  ;;  %v702_v21 = vpop.f32.mrb[17].mxu1 }
 0x1f6   :  { %741 = vst [vmem:[%s1348_s4 + $0x40] sm:$0xff] %v702_v21  ;;  %v924_v22 = vpop.f32.mrb[18].mxu1 }
 0x1f7   :  { %744 = vst [vmem:[%s1348_s4 + $0x58] sm:$0xff] %v924_v22  ;;  %v705_v23 = vpop.f32.mrb[19].mxu1 }
 0x1f8   :  { %742 = vst [vmem:[%s1348_s4 + $0x48] sm:$0xff] %v705_v23 }
 0x1fc   :  { %v927_v24 = vpop.f32.mrb[20].mxu1 }
 0x1fd   :  { %747 = vst [vmem:[%s1348_s4 + $0x70] sm:$0xff] %v927_v24  ;;  %v718_v26 = vpop.f32.mrb[21].mxu1 }
 0x1fe   :  { %745 = vst [vmem:[%s1348_s4 + $0x60] sm:$0xff] %v718_v26  ;;  %v928_v27 = vpop.f32.mrb[22].mxu1 }
 0x1ff   :  { %748 = vst [vmem:[%s1348_s4 + $0x78] sm:$0xff] %v928_v27  ;;  %v721_v28 = vpop.f32.mrb[23].mxu1 }
 0x200   :  { %746 = vst [vmem:[%s1348_s4 + $0x68] sm:$0xff] %v721_v28 }

</bundles_post_ra>
